<compile_context>
chip_gen: v7x
topology: tpu7x:2x2x1
jax: 0.10.0
libtpu: 0.0.40
codegen_flags: <defaults>
</compile_context>

<pallas_src>
import functools

import jax
import jax.numpy as jnp
import numpy as np
from jax.experimental import pallas as pl


# ----------------------------------------------------------------------------
# Fused kernel: bidirectional LSTM recurrence + fc_mu / fc_sigma + reparam.
# ----------------------------------------------------------------------------
def _bilstm_vae_kernel(
    x_ref,        # (T*B, D)   inputs, flattened time-major
    wih_ref,      # (D, 8H)    [W_ih_fwd^T | W_ih_bwd^T]
    b_ref,        # (1, 8H)    [(b_ih+b_hh)_fwd | (b_ih+b_hh)_bwd]
    whhf_ref,     # (H, 4H)    W_hh_fwd^T
    whhb_ref,     # (H, 4H)    W_hh_bwd^T
    wmuf_ref,     # (H, Nz)    fc_mu weight, forward-hidden half, transposed
    wmub_ref,     # (H, Nz)    fc_mu weight, backward-hidden half, transposed
    bmu_ref,      # (1, Nz)
    wsgf_ref,     # (H, Nz)    fc_sigma weight halves, transposed
    wsgb_ref,     # (H, Nz)
    bsg_ref,      # (1, Nz)
    n_ref,        # (B, Nz)    N ~ Normal(0, 1)
    z_ref,        # (B, Nz) out
    mu_ref,       # (B, Nz) out
    sighat_ref,   # (B, Nz) out
    *, T, B, H,
):
    G = 4 * H

    # --- Hoisted input projection for both directions (one matmul, done once).
    gx = (
        jnp.dot(x_ref[...], wih_ref[...], preferred_element_type=jnp.float32)
        + b_ref[...]
    )                                  # (T*B, 8H)
    gx_f = gx[:, :G]                   # lane-tile-aligned split (4H = 128)
    gx_b = gx[:, G:]

    whh_f = whhf_ref[...]
    whh_b = whhb_ref[...]

    def cell(gates, c):
        # Full-width activations (gate order i, f, g, o), slice afterwards.
        sg = jax.nn.sigmoid(gates)     # (B, 4H)
        tg = jnp.tanh(gates)           # (B, 4H)
        i = sg[:, 0 * H:1 * H]
        f = sg[:, 1 * H:2 * H]
        g = tg[:, 2 * H:3 * H]
        o = sg[:, 3 * H:4 * H]
        c_new = f * c + i * g
        h_new = o * jnp.tanh(c_new)
        return h_new, c_new

    h_f = jnp.zeros((B, H), jnp.float32)
    c_f = jnp.zeros((B, H), jnp.float32)
    h_b = jnp.zeros((B, H), jnp.float32)
    c_b = jnp.zeros((B, H), jnp.float32)

    # Fully unrolled recurrence (T static & small): the two independent
    # directions are interleaved per step for ILP on the serial chain.
    for t in range(T):
        gf = gx_f[t * B:(t + 1) * B, :]            # x-proj of step t (fwd)
        gb = gx_b[(T - 1 - t) * B:(T - t) * B, :]  # x-proj of step T-1-t (bwd)
        gates_f = gf + jnp.dot(h_f, whh_f, preferred_element_type=jnp.float32)
        gates_b = gb + jnp.dot(h_b, whh_b, preferred_element_type=jnp.float32)
        h_f, c_f = cell(gates_f, c_f)
        h_b, c_b = cell(gates_b, c_b)

    # --- Fused VAE head: hidden_cat = [h_f | h_b] expressed as split dots.
    mu = (
        jnp.dot(h_f, wmuf_ref[...], preferred_element_type=jnp.float32)
        + jnp.dot(h_b, wmub_ref[...], preferred_element_type=jnp.float32)
        + bmu_ref[...]
    )
    sig_hat = (
        jnp.dot(h_f, wsgf_ref[...], preferred_element_type=jnp.float32)
        + jnp.dot(h_b, wsgb_ref[...], preferred_element_type=jnp.float32)
        + bsg_ref[...]
    )
    sigma = jnp.exp(sig_hat * 0.5)
    z_ref[...] = mu + sigma * n_ref[...]
    mu_ref[...] = mu
    sighat_ref[...] = sig_hat


# ----------------------------------------------------------------------------
# One-time parameter preparation (transposes / folds done OUTSIDE the forward)
# ----------------------------------------------------------------------------
def prepare_params(params):
    """Pre-transpose and pre-fold PyTorch-layout parameters (call once)."""
    H = params["w_hh_fwd"].shape[1]
    wih_both_t = jnp.concatenate(
        [params["w_ih_fwd"].T, params["w_ih_bwd"].T], axis=1
    ).astype(jnp.float32)                                            # (D, 8H)
    b_both = jnp.concatenate(
        [params["b_ih_fwd"] + params["b_hh_fwd"],
         params["b_ih_bwd"] + params["b_hh_bwd"]], axis=0
    )[None, :].astype(jnp.float32)                                   # (1, 8H)
    return {
        "wih_both_t": wih_both_t,
        "b_both": b_both,
        "whh_fwd_t": params["w_hh_fwd"].T.astype(jnp.float32),       # (H, 4H)
        "whh_bwd_t": params["w_hh_bwd"].T.astype(jnp.float32),       # (H, 4H)
        "w_mu_f_t": params["w_mu"][:, :H].T.astype(jnp.float32),     # (H, Nz)
        "w_mu_b_t": params["w_mu"][:, H:].T.astype(jnp.float32),     # (H, Nz)
        "b_mu": params["b_mu"][None, :].astype(jnp.float32),         # (1, Nz)
        "w_sig_f_t": params["w_sigma"][:, :H].T.astype(jnp.float32),
        "w_sig_b_t": params["w_sigma"][:, H:].T.astype(jnp.float32),
        "b_sigma": params["b_sigma"][None, :].astype(jnp.float32),
    }


# ----------------------------------------------------------------------------
# Full BiLSTMEncoder forward (single fused pallas_call)
# ----------------------------------------------------------------------------
@jax.jit
def bilstm_encoder_forward(prep, inputs, noise):
    """inputs: (T, B, D) seq-first. Returns (z, mu, sigma_hat), each (B, Nz)."""
    T, B, D = inputs.shape
    H = prep["whh_fwd_t"].shape[0]
    Nz = prep["b_mu"].shape[1]

    x_flat = jnp.asarray(inputs, jnp.float32).reshape(T * B, D)

    kernel = functools.partial(_bilstm_vae_kernel, T=T, B=B, H=H)
    z, mu, sig_hat = pl.pallas_call(
        kernel,
        out_shape=(
            jax.ShapeDtypeStruct((B, Nz), jnp.float32),
            jax.ShapeDtypeStruct((B, Nz), jnp.float32),
            jax.ShapeDtypeStruct((B, Nz), jnp.float32),
        ),
    )(
        x_flat,
        prep["wih_both_t"], prep["b_both"],
        prep["whh_fwd_t"], prep["whh_bwd_t"],
        prep["w_mu_f_t"], prep["w_mu_b_t"], prep["b_mu"],
        prep["w_sig_f_t"], prep["w_sig_b_t"], prep["b_sigma"],
        jnp.asarray(noise, jnp.float32),
    )
    return z, mu, sig_hat


# ----------------------------------------------------------------------------
# Pure-JAX reference (for correctness check)
# ----------------------------------------------------------------------------
def _ref_lstm_dir(x, w_ih, w_hh, b_ih, b_hh, reverse):
    T, B, D = x.shape
    H = w_hh.shape[1]
    h = jnp.zeros((B, H), jnp.float32)
    c = jnp.zeros((B, H), jnp.float32)
    ts = range(T - 1, -1, -1) if reverse else range(T)
    for t in ts:
        gates = x[t] @ w_ih.T + h @ w_hh.T + b_ih + b_hh
        i = jax.nn.sigmoid(gates[:, 0 * H:1 * H])
        f = jax.nn.sigmoid(gates[:, 1 * H:2 * H])
        g = jnp.tanh(gates[:, 2 * H:3 * H])
        o = jax.nn.sigmoid(gates[:, 3 * H:4 * H])
        c = f * c + i * g
        h = o * jnp.tanh(c)
    return h


def _ref_forward(params, inputs, noise):
    h_fwd = _ref_lstm_dir(inputs, params["w_ih_fwd"], params["w_hh_fwd"],
                          params["b_ih_fwd"], params["b_hh_fwd"], False)
    h_bwd = _ref_lstm_dir(inputs, params["w_ih_bwd"], params["w_hh_bwd"],
                          params["b_ih_bwd"], params["b_hh_bwd"], True)
    hcat = jnp.concatenate([h_fwd, h_bwd], axis=1)
    mu = hcat @ params["w_mu"].T + params["b_mu"]
    sig_hat = hcat @ params["w_sigma"].T + params["b_sigma"]
    z = mu + jnp.exp(sig_hat / 2.0) * noise
    return z, mu, sig_hat


# ----------------------------------------------------------------------------
# Deterministic parameter init (shapes per nn.LSTM / nn.Linear in __init__)
# ----------------------------------------------------------------------------
def init_params(key, input_dim, hidden, nz):
    ks = jax.random.split(key, 12)
    s = 1.0 / np.sqrt(hidden)

    def u(k, shape):
        return jax.random.uniform(k, shape, jnp.float32, -s, s)

    return {
        # forward direction
        "w_ih_fwd": u(ks[0], (4 * hidden, input_dim)),
        "w_hh_fwd": u(ks[1], (4 * hidden, hidden)),
        "b_ih_fwd": u(ks[2], (4 * hidden,)),
        "b_hh_fwd": u(ks[3], (4 * hidden,)),
        # backward direction
        "w_ih_bwd": u(ks[4], (4 * hidden, input_dim)),
        "w_hh_bwd": u(ks[5], (4 * hidden, hidden)),
        "b_ih_bwd": u(ks[6], (4 * hidden,)),
        "b_hh_bwd": u(ks[7], (4 * hidden,)),
        # fc_mu / fc_sigma : in = 2 * enc_layers * hidden (enc_layers = 1)
        "w_mu": u(ks[8], (nz, 2 * hidden)),
        "b_mu": u(ks[9], (nz,)),
        "w_sigma": u(ks[10], (nz, 2 * hidden)),
        "b_sigma": u(ks[11], (nz,)),
    }


if __name__ == "__main__":
    # hp: input_dim=8, enc_hidden_size=32, enc_layers=1, dropout=0.0, Nz=16
    T, B, D, H, NZ = 8, 2, 8, 32, 16

    key = jax.random.PRNGKey(0)
    k_param, k_x, k_noise = jax.random.split(key, 3)

    params = init_params(k_param, D, H, NZ)
    prep = prepare_params(params)                             # one-time fold
    inputs = jax.random.normal(k_x, (T, B, D), jnp.float32)   # (seq, batch, dim)
    noise = jax.random.normal(k_noise, (B, NZ), jnp.float32)  # N ~ Normal(0,1)

    z, mu, sigma_hat = bilstm_encoder_forward(prep, inputs, noise)
    jax.block_until_ready((z, mu, sigma_hat))

    z_r, mu_r, sh_r = _ref_forward(params, inputs, noise)
    np.testing.assert_allclose(np.asarray(mu), np.asarray(mu_r), rtol=1e-5, atol=1e-5)
    np.testing.assert_allclose(np.asarray(sigma_hat), np.asarray(sh_r), rtol=1e-5, atol=1e-5)
    np.testing.assert_allclose(np.asarray(z), np.asarray(z_r), rtol=1e-5, atol=1e-5)

    print("KERNEL_OK")
</pallas_src>

<mosaic_0001>
module attributes {stable_mosaic.version = 11 : i64} {
  func.func @_bilstm_vae_kernel(%arg0: memref<16x8xf32, #tpu.memory_space<vmem>>, %arg1: memref<8x256xf32, #tpu.memory_space<vmem>>, %arg2: memref<1x256xf32, #tpu.memory_space<vmem>>, %arg3: memref<32x128xf32, #tpu.memory_space<vmem>>, %arg4: memref<32x128xf32, #tpu.memory_space<vmem>>, %arg5: memref<32x16xf32, #tpu.memory_space<vmem>>, %arg6: memref<32x16xf32, #tpu.memory_space<vmem>>, %arg7: memref<1x16xf32, #tpu.memory_space<vmem>>, %arg8: memref<32x16xf32, #tpu.memory_space<vmem>>, %arg9: memref<32x16xf32, #tpu.memory_space<vmem>>, %arg10: memref<1x16xf32, #tpu.memory_space<vmem>>, %arg11: memref<2x16xf32, #tpu.memory_space<vmem>>, %arg12: memref<2x16xf32, #tpu.memory_space<vmem>>, %arg13: memref<2x16xf32, #tpu.memory_space<vmem>>, %arg14: memref<2x16xf32, #tpu.memory_space<vmem>>) attributes {dimension_semantics = [], scalar_prefetch = 0 : i64, scratch_operands = 0 : i64, tpu.core_type = #tpu.core_type<tc>} {
    %c0 = arith.constant 0 : index
    %c0_0 = arith.constant 0 : index
    %0 = vector.load %arg0[%c0, %c0_0] : memref<16x8xf32, #tpu.memory_space<vmem>>, vector<16x8xf32>
    %c0_1 = arith.constant 0 : index
    %c0_2 = arith.constant 0 : index
    %1 = vector.load %arg1[%c0_1, %c0_2] : memref<8x256xf32, #tpu.memory_space<vmem>>, vector<8x256xf32>
    %cst = arith.constant dense<0.000000e+00> : vector<16x256xf32>
    %2 = tpu.matmul %0, %1, %cst {dimension_numbers = #tpu.dot_dimension_numbers<[1], [0], [0], [1], [0, 0, 1, 1], [], []>} : vector<16x8xf32>, vector<8x256xf32>, vector<16x256xf32> -> vector<16x256xf32>
    %c0_3 = arith.constant 0 : index
    %c0_4 = arith.constant 0 : index
    %3 = vector.load %arg2[%c0_3, %c0_4] : memref<1x256xf32, #tpu.memory_space<vmem>>, vector<1x256xf32>
    %4 = vector.broadcast %3 : vector<1x256xf32> to vector<16x256xf32>
    %5 = arith.addf %2, %4 : vector<16x256xf32>
    %6 = vector.extract_strided_slice %5 {offsets = [0, 0], sizes = [16, 128], strides = [1, 1]} : vector<16x256xf32> to vector<16x128xf32>
    %7 = vector.extract_strided_slice %5 {offsets = [0, 128], sizes = [16, 128], strides = [1, 1]} : vector<16x256xf32> to vector<16x128xf32>
    %c0_5 = arith.constant 0 : index
    %c0_6 = arith.constant 0 : index
    %8 = vector.load %arg3[%c0_5, %c0_6] : memref<32x128xf32, #tpu.memory_space<vmem>>, vector<32x128xf32>
    %c0_7 = arith.constant 0 : index
    %c0_8 = arith.constant 0 : index
    %9 = vector.load %arg4[%c0_7, %c0_8] : memref<32x128xf32, #tpu.memory_space<vmem>>, vector<32x128xf32>
    %cst_9 = arith.constant 0.000000e+00 : f32
    %10 = vector.broadcast %cst_9 : f32 to vector<2x32xf32>
    %cst_10 = arith.constant 0.000000e+00 : f32
    %11 = vector.broadcast %cst_10 : f32 to vector<2x32xf32>
    %cst_11 = arith.constant 0.000000e+00 : f32
    %12 = vector.broadcast %cst_11 : f32 to vector<2x32xf32>
    %cst_12 = arith.constant 0.000000e+00 : f32
    %13 = vector.broadcast %cst_12 : f32 to vector<2x32xf32>
    %14 = vector.extract_strided_slice %6 {offsets = [0, 0], sizes = [2, 128], strides = [1, 1]} : vector<16x128xf32> to vector<2x128xf32>
    %15 = vector.extract_strided_slice %7 {offsets = [14, 0], sizes = [2, 128], strides = [1, 1]} : vector<16x128xf32> to vector<2x128xf32>
    %cst_13 = arith.constant dense<0.000000e+00> : vector<2x128xf32>
    %16 = tpu.matmul %10, %8, %cst_13 {dimension_numbers = #tpu.dot_dimension_numbers<[1], [0], [0], [1], [0, 0, 1, 1], [], []>} : vector<2x32xf32>, vector<32x128xf32>, vector<2x128xf32> -> vector<2x128xf32>
    %17 = arith.addf %14, %16 : vector<2x128xf32>
    %cst_14 = arith.constant dense<0.000000e+00> : vector<2x128xf32>
    %18 = tpu.matmul %12, %9, %cst_14 {dimension_numbers = #tpu.dot_dimension_numbers<[1], [0], [0], [1], [0, 0, 1, 1], [], []>} : vector<2x32xf32>, vector<32x128xf32>, vector<2x128xf32> -> vector<2x128xf32>
    %19 = arith.addf %15, %18 : vector<2x128xf32>
    %20 = arith.negf %17 : vector<2x128xf32>
    %21 = math.exp %20 : vector<2x128xf32>
    %cst_15 = arith.constant 1.000000e+00 : f32
    %22 = vector.broadcast %cst_15 : f32 to vector<2x128xf32>
    %23 = arith.addf %22, %21 : vector<2x128xf32>
    %24 = arith.divf %22, %23 : vector<2x128xf32>
    %25 = math.tanh %17 : vector<2x128xf32>
    %26 = vector.extract_strided_slice %24 {offsets = [0, 0], sizes = [2, 32], strides = [1, 1]} : vector<2x128xf32> to vector<2x32xf32>
    %27 = vector.extract_strided_slice %24 {offsets = [0, 32], sizes = [2, 32], strides = [1, 1]} : vector<2x128xf32> to vector<2x32xf32>
    %28 = vector.extract_strided_slice %25 {offsets = [0, 64], sizes = [2, 32], strides = [1, 1]} : vector<2x128xf32> to vector<2x32xf32>
    %29 = vector.extract_strided_slice %24 {offsets = [0, 96], sizes = [2, 32], strides = [1, 1]} : vector<2x128xf32> to vector<2x32xf32>
    %30 = arith.mulf %27, %11 : vector<2x32xf32>
    %31 = arith.mulf %26, %28 : vector<2x32xf32>
    %32 = arith.addf %30, %31 : vector<2x32xf32>
    %33 = math.tanh %32 : vector<2x32xf32>
    %34 = arith.mulf %29, %33 : vector<2x32xf32>
    %35 = arith.negf %19 : vector<2x128xf32>
    %36 = math.exp %35 : vector<2x128xf32>
    %cst_16 = arith.constant 1.000000e+00 : f32
    %37 = vector.broadcast %cst_16 : f32 to vector<2x128xf32>
    %38 = arith.addf %37, %36 : vector<2x128xf32>
    %39 = arith.divf %37, %38 : vector<2x128xf32>
    %40 = math.tanh %19 : vector<2x128xf32>
    %41 = vector.extract_strided_slice %39 {offsets = [0, 0], sizes = [2, 32], strides = [1, 1]} : vector<2x128xf32> to vector<2x32xf32>
    %42 = vector.extract_strided_slice %39 {offsets = [0, 32], sizes = [2, 32], strides = [1, 1]} : vector<2x128xf32> to vector<2x32xf32>
    %43 = vector.extract_strided_slice %40 {offsets = [0, 64], sizes = [2, 32], strides = [1, 1]} : vector<2x128xf32> to vector<2x32xf32>
    %44 = vector.extract_strided_slice %39 {offsets = [0, 96], sizes = [2, 32], strides = [1, 1]} : vector<2x128xf32> to vector<2x32xf32>
    %45 = arith.mulf %42, %13 : vector<2x32xf32>
    %46 = arith.mulf %41, %43 : vector<2x32xf32>
    %47 = arith.addf %45, %46 : vector<2x32xf32>
    %48 = math.tanh %47 : vector<2x32xf32>
    %49 = arith.mulf %44, %48 : vector<2x32xf32>
    %50 = vector.extract_strided_slice %6 {offsets = [2, 0], sizes = [2, 128], strides = [1, 1]} : vector<16x128xf32> to vector<2x128xf32>
    %51 = vector.extract_strided_slice %7 {offsets = [12, 0], sizes = [2, 128], strides = [1, 1]} : vector<16x128xf32> to vector<2x128xf32>
    %cst_17 = arith.constant dense<0.000000e+00> : vector<2x128xf32>
    %52 = tpu.matmul %34, %8, %cst_17 {dimension_numbers = #tpu.dot_dimension_numbers<[1], [0], [0], [1], [0, 0, 1, 1], [], []>} : vector<2x32xf32>, vector<32x128xf32>, vector<2x128xf32> -> vector<2x128xf32>
    %53 = arith.addf %50, %52 : vector<2x128xf32>
    %cst_18 = arith.constant dense<0.000000e+00> : vector<2x128xf32>
    %54 = tpu.matmul %49, %9, %cst_18 {dimension_numbers = #tpu.dot_dimension_numbers<[1], [0], [0], [1], [0, 0, 1, 1], [], []>} : vector<2x32xf32>, vector<32x128xf32>, vector<2x128xf32> -> vector<2x128xf32>
    %55 = arith.addf %51, %54 : vector<2x128xf32>
    %56 = arith.negf %53 : vector<2x128xf32>
    %57 = math.exp %56 : vector<2x128xf32>
    %cst_19 = arith.constant 1.000000e+00 : f32
    %58 = vector.broadcast %cst_19 : f32 to vector<2x128xf32>
    %59 = arith.addf %58, %57 : vector<2x128xf32>
    %60 = arith.divf %58, %59 : vector<2x128xf32>
    %61 = math.tanh %53 : vector<2x128xf32>
    %62 = vector.extract_strided_slice %60 {offsets = [0, 0], sizes = [2, 32], strides = [1, 1]} : vector<2x128xf32> to vector<2x32xf32>
    %63 = vector.extract_strided_slice %60 {offsets = [0, 32], sizes = [2, 32], strides = [1, 1]} : vector<2x128xf32> to vector<2x32xf32>
    %64 = vector.extract_strided_slice %61 {offsets = [0, 64], sizes = [2, 32], strides = [1, 1]} : vector<2x128xf32> to vector<2x32xf32>
    %65 = vector.extract_strided_slice %60 {offsets = [0, 96], sizes = [2, 32], strides = [1, 1]} : vector<2x128xf32> to vector<2x32xf32>
    %66 = arith.mulf %63, %32 : vector<2x32xf32>
    %67 = arith.mulf %62, %64 : vector<2x32xf32>
    %68 = arith.addf %66, %67 : vector<2x32xf32>
    %69 = math.tanh %68 : vector<2x32xf32>
    %70 = arith.mulf %65, %69 : vector<2x32xf32>
    %71 = arith.negf %55 : vector<2x128xf32>
    %72 = math.exp %71 : vector<2x128xf32>
    %cst_20 = arith.constant 1.000000e+00 : f32
    %73 = vector.broadcast %cst_20 : f32 to vector<2x128xf32>
    %74 = arith.addf %73, %72 : vector<2x128xf32>
    %75 = arith.divf %73, %74 : vector<2x128xf32>
    %76 = math.tanh %55 : vector<2x128xf32>
    %77 = vector.extract_strided_slice %75 {offsets = [0, 0], sizes = [2, 32], strides = [1, 1]} : vector<2x128xf32> to vector<2x32xf32>
    %78 = vector.extract_strided_slice %75 {offsets = [0, 32], sizes = [2, 32], strides = [1, 1]} : vector<2x128xf32> to vector<2x32xf32>
    %79 = vector.extract_strided_slice %76 {offsets = [0, 64], sizes = [2, 32], strides = [1, 1]} : vector<2x128xf32> to vector<2x32xf32>
    %80 = vector.extract_strided_slice %75 {offsets = [0, 96], sizes = [2, 32], strides = [1, 1]} : vector<2x128xf32> to vector<2x32xf32>
    %81 = arith.mulf %78, %47 : vector<2x32xf32>
    %82 = arith.mulf %77, %79 : vector<2x32xf32>
    %83 = arith.addf %81, %82 : vector<2x32xf32>
    %84 = math.tanh %83 : vector<2x32xf32>
    %85 = arith.mulf %80, %84 : vector<2x32xf32>
    %86 = vector.extract_strided_slice %6 {offsets = [4, 0], sizes = [2, 128], strides = [1, 1]} : vector<16x128xf32> to vector<2x128xf32>
    %87 = vector.extract_strided_slice %7 {offsets = [10, 0], sizes = [2, 128], strides = [1, 1]} : vector<16x128xf32> to vector<2x128xf32>
    %cst_21 = arith.constant dense<0.000000e+00> : vector<2x128xf32>
    %88 = tpu.matmul %70, %8, %cst_21 {dimension_numbers = #tpu.dot_dimension_numbers<[1], [0], [0], [1], [0, 0, 1, 1], [], []>} : vector<2x32xf32>, vector<32x128xf32>, vector<2x128xf32> -> vector<2x128xf32>
    %89 = arith.addf %86, %88 : vector<2x128xf32>
    %cst_22 = arith.constant dense<0.000000e+00> : vector<2x128xf32>
    %90 = tpu.matmul %85, %9, %cst_22 {dimension_numbers = #tpu.dot_dimension_numbers<[1], [0], [0], [1], [0, 0, 1, 1], [], []>} : vector<2x32xf32>, vector<32x128xf32>, vector<2x128xf32> -> vector<2x128xf32>
    %91 = arith.addf %87, %90 : vector<2x128xf32>
    %92 = arith.negf %89 : vector<2x128xf32>
    %93 = math.exp %92 : vector<2x128xf32>
    %cst_23 = arith.constant 1.000000e+00 : f32
    %94 = vector.broadcast %cst_23 : f32 to vector<2x128xf32>
    %95 = arith.addf %94, %93 : vector<2x128xf32>
    %96 = arith.divf %94, %95 : vector<2x128xf32>
    %97 = math.tanh %89 : vector<2x128xf32>
    %98 = vector.extract_strided_slice %96 {offsets = [0, 0], sizes = [2, 32], strides = [1, 1]} : vector<2x128xf32> to vector<2x32xf32>
    %99 = vector.extract_strided_slice %96 {offsets = [0, 32], sizes = [2, 32], strides = [1, 1]} : vector<2x128xf32> to vector<2x32xf32>
    %100 = vector.extract_strided_slice %97 {offsets = [0, 64], sizes = [2, 32], strides = [1, 1]} : vector<2x128xf32> to vector<2x32xf32>
    %101 = vector.extract_strided_slice %96 {offsets = [0, 96], sizes = [2, 32], strides = [1, 1]} : vector<2x128xf32> to vector<2x32xf32>
    %102 = arith.mulf %99, %68 : vector<2x32xf32>
    %103 = arith.mulf %98, %100 : vector<2x32xf32>
    %104 = arith.addf %102, %103 : vector<2x32xf32>
    %105 = math.tanh %104 : vector<2x32xf32>
    %106 = arith.mulf %101, %105 : vector<2x32xf32>
    %107 = arith.negf %91 : vector<2x128xf32>
    %108 = math.exp %107 : vector<2x128xf32>
    %cst_24 = arith.constant 1.000000e+00 : f32
    %109 = vector.broadcast %cst_24 : f32 to vector<2x128xf32>
    %110 = arith.addf %109, %108 : vector<2x128xf32>
    %111 = arith.divf %109, %110 : vector<2x128xf32>
    %112 = math.tanh %91 : vector<2x128xf32>
    %113 = vector.extract_strided_slice %111 {offsets = [0, 0], sizes = [2, 32], strides = [1, 1]} : vector<2x128xf32> to vector<2x32xf32>
    %114 = vector.extract_strided_slice %111 {offsets = [0, 32], sizes = [2, 32], strides = [1, 1]} : vector<2x128xf32> to vector<2x32xf32>
    %115 = vector.extract_strided_slice %112 {offsets = [0, 64], sizes = [2, 32], strides = [1, 1]} : vector<2x128xf32> to vector<2x32xf32>
    %116 = vector.extract_strided_slice %111 {offsets = [0, 96], sizes = [2, 32], strides = [1, 1]} : vector<2x128xf32> to vector<2x32xf32>
    %117 = arith.mulf %114, %83 : vector<2x32xf32>
    %118 = arith.mulf %113, %115 : vector<2x32xf32>
    %119 = arith.addf %117, %118 : vector<2x32xf32>
    %120 = math.tanh %119 : vector<2x32xf32>
    %121 = arith.mulf %116, %120 : vector<2x32xf32>
    %122 = vector.extract_strided_slice %6 {offsets = [6, 0], sizes = [2, 128], strides = [1, 1]} : vector<16x128xf32> to vector<2x128xf32>
    %123 = vector.extract_strided_slice %7 {offsets = [8, 0], sizes = [2, 128], strides = [1, 1]} : vector<16x128xf32> to vector<2x128xf32>
    %cst_25 = arith.constant dense<0.000000e+00> : vector<2x128xf32>
    %124 = tpu.matmul %106, %8, %cst_25 {dimension_numbers = #tpu.dot_dimension_numbers<[1], [0], [0], [1], [0, 0, 1, 1], [], []>} : vector<2x32xf32>, vector<32x128xf32>, vector<2x128xf32> -> vector<2x128xf32>
    %125 = arith.addf %122, %124 : vector<2x128xf32>
    %cst_26 = arith.constant dense<0.000000e+00> : vector<2x128xf32>
    %126 = tpu.matmul %121, %9, %cst_26 {dimension_numbers = #tpu.dot_dimension_numbers<[1], [0], [0], [1], [0, 0, 1, 1], [], []>} : vector<2x32xf32>, vector<32x128xf32>, vector<2x128xf32> -> vector<2x128xf32>
    %127 = arith.addf %123, %126 : vector<2x128xf32>
    %128 = arith.negf %125 : vector<2x128xf32>
    %129 = math.exp %128 : vector<2x128xf32>
    %cst_27 = arith.constant 1.000000e+00 : f32
    %130 = vector.broadcast %cst_27 : f32 to vector<2x128xf32>
    %131 = arith.addf %130, %129 : vector<2x128xf32>
    %132 = arith.divf %130, %131 : vector<2x128xf32>
    %133 = math.tanh %125 : vector<2x128xf32>
    %134 = vector.extract_strided_slice %132 {offsets = [0, 0], sizes = [2, 32], strides = [1, 1]} : vector<2x128xf32> to vector<2x32xf32>
    %135 = vector.extract_strided_slice %132 {offsets = [0, 32], sizes = [2, 32], strides = [1, 1]} : vector<2x128xf32> to vector<2x32xf32>
    %136 = vector.extract_strided_slice %133 {offsets = [0, 64], sizes = [2, 32], strides = [1, 1]} : vector<2x128xf32> to vector<2x32xf32>
    %137 = vector.extract_strided_slice %132 {offsets = [0, 96], sizes = [2, 32], strides = [1, 1]} : vector<2x128xf32> to vector<2x32xf32>
    %138 = arith.mulf %135, %104 : vector<2x32xf32>
    %139 = arith.mulf %134, %136 : vector<2x32xf32>
    %140 = arith.addf %138, %139 : vector<2x32xf32>
    %141 = math.tanh %140 : vector<2x32xf32>
    %142 = arith.mulf %137, %141 : vector<2x32xf32>
    %143 = arith.negf %127 : vector<2x128xf32>
    %144 = math.exp %143 : vector<2x128xf32>
    %cst_28 = arith.constant 1.000000e+00 : f32
    %145 = vector.broadcast %cst_28 : f32 to vector<2x128xf32>
    %146 = arith.addf %145, %144 : vector<2x128xf32>
    %147 = arith.divf %145, %146 : vector<2x128xf32>
    %148 = math.tanh %127 : vector<2x128xf32>
    %149 = vector.extract_strided_slice %147 {offsets = [0, 0], sizes = [2, 32], strides = [1, 1]} : vector<2x128xf32> to vector<2x32xf32>
    %150 = vector.extract_strided_slice %147 {offsets = [0, 32], sizes = [2, 32], strides = [1, 1]} : vector<2x128xf32> to vector<2x32xf32>
    %151 = vector.extract_strided_slice %148 {offsets = [0, 64], sizes = [2, 32], strides = [1, 1]} : vector<2x128xf32> to vector<2x32xf32>
    %152 = vector.extract_strided_slice %147 {offsets = [0, 96], sizes = [2, 32], strides = [1, 1]} : vector<2x128xf32> to vector<2x32xf32>
    %153 = arith.mulf %150, %119 : vector<2x32xf32>
    %154 = arith.mulf %149, %151 : vector<2x32xf32>
    %155 = arith.addf %153, %154 : vector<2x32xf32>
    %156 = math.tanh %155 : vector<2x32xf32>
    %157 = arith.mulf %152, %156 : vector<2x32xf32>
    %158 = vector.extract_strided_slice %6 {offsets = [8, 0], sizes = [2, 128], strides = [1, 1]} : vector<16x128xf32> to vector<2x128xf32>
    %159 = vector.extract_strided_slice %7 {offsets = [6, 0], sizes = [2, 128], strides = [1, 1]} : vector<16x128xf32> to vector<2x128xf32>
    %cst_29 = arith.constant dense<0.000000e+00> : vector<2x128xf32>
    %160 = tpu.matmul %142, %8, %cst_29 {dimension_numbers = #tpu.dot_dimension_numbers<[1], [0], [0], [1], [0, 0, 1, 1], [], []>} : vector<2x32xf32>, vector<32x128xf32>, vector<2x128xf32> -> vector<2x128xf32>
    %161 = arith.addf %158, %160 : vector<2x128xf32>
    %cst_30 = arith.constant dense<0.000000e+00> : vector<2x128xf32>
    %162 = tpu.matmul %157, %9, %cst_30 {dimension_numbers = #tpu.dot_dimension_numbers<[1], [0], [0], [1], [0, 0, 1, 1], [], []>} : vector<2x32xf32>, vector<32x128xf32>, vector<2x128xf32> -> vector<2x128xf32>
    %163 = arith.addf %159, %162 : vector<2x128xf32>
    %164 = arith.negf %161 : vector<2x128xf32>
    %165 = math.exp %164 : vector<2x128xf32>
    %cst_31 = arith.constant 1.000000e+00 : f32
    %166 = vector.broadcast %cst_31 : f32 to vector<2x128xf32>
    %167 = arith.addf %166, %165 : vector<2x128xf32>
    %168 = arith.divf %166, %167 : vector<2x128xf32>
    %169 = math.tanh %161 : vector<2x128xf32>
    %170 = vector.extract_strided_slice %168 {offsets = [0, 0], sizes = [2, 32], strides = [1, 1]} : vector<2x128xf32> to vector<2x32xf32>
    %171 = vector.extract_strided_slice %168 {offsets = [0, 32], sizes = [2, 32], strides = [1, 1]} : vector<2x128xf32> to vector<2x32xf32>
    %172 = vector.extract_strided_slice %169 {offsets = [0, 64], sizes = [2, 32], strides = [1, 1]} : vector<2x128xf32> to vector<2x32xf32>
    %173 = vector.extract_strided_slice %168 {offsets = [0, 96], sizes = [2, 32], strides = [1, 1]} : vector<2x128xf32> to vector<2x32xf32>
    %174 = arith.mulf %171, %140 : vector<2x32xf32>
    %175 = arith.mulf %170, %172 : vector<2x32xf32>
    %176 = arith.addf %174, %175 : vector<2x32xf32>
    %177 = math.tanh %176 : vector<2x32xf32>
    %178 = arith.mulf %173, %177 : vector<2x32xf32>
    %179 = arith.negf %163 : vector<2x128xf32>
    %180 = math.exp %179 : vector<2x128xf32>
    %cst_32 = arith.constant 1.000000e+00 : f32
    %181 = vector.broadcast %cst_32 : f32 to vector<2x128xf32>
    %182 = arith.addf %181, %180 : vector<2x128xf32>
    %183 = arith.divf %181, %182 : vector<2x128xf32>
    %184 = math.tanh %163 : vector<2x128xf32>
    %185 = vector.extract_strided_slice %183 {offsets = [0, 0], sizes = [2, 32], strides = [1, 1]} : vector<2x128xf32> to vector<2x32xf32>
    %186 = vector.extract_strided_slice %183 {offsets = [0, 32], sizes = [2, 32], strides = [1, 1]} : vector<2x128xf32> to vector<2x32xf32>
    %187 = vector.extract_strided_slice %184 {offsets = [0, 64], sizes = [2, 32], strides = [1, 1]} : vector<2x128xf32> to vector<2x32xf32>
    %188 = vector.extract_strided_slice %183 {offsets = [0, 96], sizes = [2, 32], strides = [1, 1]} : vector<2x128xf32> to vector<2x32xf32>
    %189 = arith.mulf %186, %155 : vector<2x32xf32>
    %190 = arith.mulf %185, %187 : vector<2x32xf32>
    %191 = arith.addf %189, %190 : vector<2x32xf32>
    %192 = math.tanh %191 : vector<2x32xf32>
    %193 = arith.mulf %188, %192 : vector<2x32xf32>
    %194 = vector.extract_strided_slice %6 {offsets = [10, 0], sizes = [2, 128], strides = [1, 1]} : vector<16x128xf32> to vector<2x128xf32>
    %195 = vector.extract_strided_slice %7 {offsets = [4, 0], sizes = [2, 128], strides = [1, 1]} : vector<16x128xf32> to vector<2x128xf32>
    %cst_33 = arith.constant dense<0.000000e+00> : vector<2x128xf32>
    %196 = tpu.matmul %178, %8, %cst_33 {dimension_numbers = #tpu.dot_dimension_numbers<[1], [0], [0], [1], [0, 0, 1, 1], [], []>} : vector<2x32xf32>, vector<32x128xf32>, vector<2x128xf32> -> vector<2x128xf32>
    %197 = arith.addf %194, %196 : vector<2x128xf32>
    %cst_34 = arith.constant dense<0.000000e+00> : vector<2x128xf32>
    %198 = tpu.matmul %193, %9, %cst_34 {dimension_numbers = #tpu.dot_dimension_numbers<[1], [0], [0], [1], [0, 0, 1, 1], [], []>} : vector<2x32xf32>, vector<32x128xf32>, vector<2x128xf32> -> vector<2x128xf32>
    %199 = arith.addf %195, %198 : vector<2x128xf32>
    %200 = arith.negf %197 : vector<2x128xf32>
    %201 = math.exp %200 : vector<2x128xf32>
    %cst_35 = arith.constant 1.000000e+00 : f32
    %202 = vector.broadcast %cst_35 : f32 to vector<2x128xf32>
    %203 = arith.addf %202, %201 : vector<2x128xf32>
    %204 = arith.divf %202, %203 : vector<2x128xf32>
    %205 = math.tanh %197 : vector<2x128xf32>
    %206 = vector.extract_strided_slice %204 {offsets = [0, 0], sizes = [2, 32], strides = [1, 1]} : vector<2x128xf32> to vector<2x32xf32>
    %207 = vector.extract_strided_slice %204 {offsets = [0, 32], sizes = [2, 32], strides = [1, 1]} : vector<2x128xf32> to vector<2x32xf32>
    %208 = vector.extract_strided_slice %205 {offsets = [0, 64], sizes = [2, 32], strides = [1, 1]} : vector<2x128xf32> to vector<2x32xf32>
    %209 = vector.extract_strided_slice %204 {offsets = [0, 96], sizes = [2, 32], strides = [1, 1]} : vector<2x128xf32> to vector<2x32xf32>
    %210 = arith.mulf %207, %176 : vector<2x32xf32>
    %211 = arith.mulf %206, %208 : vector<2x32xf32>
    %212 = arith.addf %210, %211 : vector<2x32xf32>
    %213 = math.tanh %212 : vector<2x32xf32>
    %214 = arith.mulf %209, %213 : vector<2x32xf32>
    %215 = arith.negf %199 : vector<2x128xf32>
    %216 = math.exp %215 : vector<2x128xf32>
    %cst_36 = arith.constant 1.000000e+00 : f32
    %217 = vector.broadcast %cst_36 : f32 to vector<2x128xf32>
    %218 = arith.addf %217, %216 : vector<2x128xf32>
    %219 = arith.divf %217, %218 : vector<2x128xf32>
    %220 = math.tanh %199 : vector<2x128xf32>
    %221 = vector.extract_strided_slice %219 {offsets = [0, 0], sizes = [2, 32], strides = [1, 1]} : vector<2x128xf32> to vector<2x32xf32>
    %222 = vector.extract_strided_slice %219 {offsets = [0, 32], sizes = [2, 32], strides = [1, 1]} : vector<2x128xf32> to vector<2x32xf32>
    %223 = vector.extract_strided_slice %220 {offsets = [0, 64], sizes = [2, 32], strides = [1, 1]} : vector<2x128xf32> to vector<2x32xf32>
    %224 = vector.extract_strided_slice %219 {offsets = [0, 96], sizes = [2, 32], strides = [1, 1]} : vector<2x128xf32> to vector<2x32xf32>
    %225 = arith.mulf %222, %191 : vector<2x32xf32>
    %226 = arith.mulf %221, %223 : vector<2x32xf32>
    %227 = arith.addf %225, %226 : vector<2x32xf32>
    %228 = math.tanh %227 : vector<2x32xf32>
    %229 = arith.mulf %224, %228 : vector<2x32xf32>
    %230 = vector.extract_strided_slice %6 {offsets = [12, 0], sizes = [2, 128], strides = [1, 1]} : vector<16x128xf32> to vector<2x128xf32>
    %231 = vector.extract_strided_slice %7 {offsets = [2, 0], sizes = [2, 128], strides = [1, 1]} : vector<16x128xf32> to vector<2x128xf32>
    %cst_37 = arith.constant dense<0.000000e+00> : vector<2x128xf32>
    %232 = tpu.matmul %214, %8, %cst_37 {dimension_numbers = #tpu.dot_dimension_numbers<[1], [0], [0], [1], [0, 0, 1, 1], [], []>} : vector<2x32xf32>, vector<32x128xf32>, vector<2x128xf32> -> vector<2x128xf32>
    %233 = arith.addf %230, %232 : vector<2x128xf32>
    %cst_38 = arith.constant dense<0.000000e+00> : vector<2x128xf32>
    %234 = tpu.matmul %229, %9, %cst_38 {dimension_numbers = #tpu.dot_dimension_numbers<[1], [0], [0], [1], [0, 0, 1, 1], [], []>} : vector<2x32xf32>, vector<32x128xf32>, vector<2x128xf32> -> vector<2x128xf32>
    %235 = arith.addf %231, %234 : vector<2x128xf32>
    %236 = arith.negf %233 : vector<2x128xf32>
    %237 = math.exp %236 : vector<2x128xf32>
    %cst_39 = arith.constant 1.000000e+00 : f32
    %238 = vector.broadcast %cst_39 : f32 to vector<2x128xf32>
    %239 = arith.addf %238, %237 : vector<2x128xf32>
    %240 = arith.divf %238, %239 : vector<2x128xf32>
    %241 = math.tanh %233 : vector<2x128xf32>
    %242 = vector.extract_strided_slice %240 {offsets = [0, 0], sizes = [2, 32], strides = [1, 1]} : vector<2x128xf32> to vector<2x32xf32>
    %243 = vector.extract_strided_slice %240 {offsets = [0, 32], sizes = [2, 32], strides = [1, 1]} : vector<2x128xf32> to vector<2x32xf32>
    %244 = vector.extract_strided_slice %241 {offsets = [0, 64], sizes = [2, 32], strides = [1, 1]} : vector<2x128xf32> to vector<2x32xf32>
    %245 = vector.extract_strided_slice %240 {offsets = [0, 96], sizes = [2, 32], strides = [1, 1]} : vector<2x128xf32> to vector<2x32xf32>
    %246 = arith.mulf %243, %212 : vector<2x32xf32>
    %247 = arith.mulf %242, %244 : vector<2x32xf32>
    %248 = arith.addf %246, %247 : vector<2x32xf32>
    %249 = math.tanh %248 : vector<2x32xf32>
    %250 = arith.mulf %245, %249 : vector<2x32xf32>
    %251 = arith.negf %235 : vector<2x128xf32>
    %252 = math.exp %251 : vector<2x128xf32>
    %cst_40 = arith.constant 1.000000e+00 : f32
    %253 = vector.broadcast %cst_40 : f32 to vector<2x128xf32>
    %254 = arith.addf %253, %252 : vector<2x128xf32>
    %255 = arith.divf %253, %254 : vector<2x128xf32>
    %256 = math.tanh %235 : vector<2x128xf32>
    %257 = vector.extract_strided_slice %255 {offsets = [0, 0], sizes = [2, 32], strides = [1, 1]} : vector<2x128xf32> to vector<2x32xf32>
    %258 = vector.extract_strided_slice %255 {offsets = [0, 32], sizes = [2, 32], strides = [1, 1]} : vector<2x128xf32> to vector<2x32xf32>
    %259 = vector.extract_strided_slice %256 {offsets = [0, 64], sizes = [2, 32], strides = [1, 1]} : vector<2x128xf32> to vector<2x32xf32>
    %260 = vector.extract_strided_slice %255 {offsets = [0, 96], sizes = [2, 32], strides = [1, 1]} : vector<2x128xf32> to vector<2x32xf32>
    %261 = arith.mulf %258, %227 : vector<2x32xf32>
    %262 = arith.mulf %257, %259 : vector<2x32xf32>
    %263 = arith.addf %261, %262 : vector<2x32xf32>
    %264 = math.tanh %263 : vector<2x32xf32>
    %265 = arith.mulf %260, %264 : vector<2x32xf32>
    %266 = vector.extract_strided_slice %6 {offsets = [14, 0], sizes = [2, 128], strides = [1, 1]} : vector<16x128xf32> to vector<2x128xf32>
    %267 = vector.extract_strided_slice %7 {offsets = [0, 0], sizes = [2, 128], strides = [1, 1]} : vector<16x128xf32> to vector<2x128xf32>
    %cst_41 = arith.constant dense<0.000000e+00> : vector<2x128xf32>
    %268 = tpu.matmul %250, %8, %cst_41 {dimension_numbers = #tpu.dot_dimension_numbers<[1], [0], [0], [1], [0, 0, 1, 1], [], []>} : vector<2x32xf32>, vector<32x128xf32>, vector<2x128xf32> -> vector<2x128xf32>
    %269 = arith.addf %266, %268 : vector<2x128xf32>
    %cst_42 = arith.constant dense<0.000000e+00> : vector<2x128xf32>
    %270 = tpu.matmul %265, %9, %cst_42 {dimension_numbers = #tpu.dot_dimension_numbers<[1], [0], [0], [1], [0, 0, 1, 1], [], []>} : vector<2x32xf32>, vector<32x128xf32>, vector<2x128xf32> -> vector<2x128xf32>
    %271 = arith.addf %267, %270 : vector<2x128xf32>
    %272 = arith.negf %269 : vector<2x128xf32>
    %273 = math.exp %272 : vector<2x128xf32>
    %cst_43 = arith.constant 1.000000e+00 : f32
    %274 = vector.broadcast %cst_43 : f32 to vector<2x128xf32>
    %275 = arith.addf %274, %273 : vector<2x128xf32>
    %276 = arith.divf %274, %275 : vector<2x128xf32>
    %277 = math.tanh %269 : vector<2x128xf32>
    %278 = vector.extract_strided_slice %276 {offsets = [0, 0], sizes = [2, 32], strides = [1, 1]} : vector<2x128xf32> to vector<2x32xf32>
    %279 = vector.extract_strided_slice %276 {offsets = [0, 32], sizes = [2, 32], strides = [1, 1]} : vector<2x128xf32> to vector<2x32xf32>
    %280 = vector.extract_strided_slice %277 {offsets = [0, 64], sizes = [2, 32], strides = [1, 1]} : vector<2x128xf32> to vector<2x32xf32>
    %281 = vector.extract_strided_slice %276 {offsets = [0, 96], sizes = [2, 32], strides = [1, 1]} : vector<2x128xf32> to vector<2x32xf32>
    %282 = arith.mulf %279, %248 : vector<2x32xf32>
    %283 = arith.mulf %278, %280 : vector<2x32xf32>
    %284 = arith.addf %282, %283 : vector<2x32xf32>
    %285 = math.tanh %284 : vector<2x32xf32>
    %286 = arith.mulf %281, %285 : vector<2x32xf32>
    %287 = arith.negf %271 : vector<2x128xf32>
    %288 = math.exp %287 : vector<2x128xf32>
    %cst_44 = arith.constant 1.000000e+00 : f32
    %289 = vector.broadcast %cst_44 : f32 to vector<2x128xf32>
    %290 = arith.addf %289, %288 : vector<2x128xf32>
    %291 = arith.divf %289, %290 : vector<2x128xf32>
    %292 = math.tanh %271 : vector<2x128xf32>
    %293 = vector.extract_strided_slice %291 {offsets = [0, 0], sizes = [2, 32], strides = [1, 1]} : vector<2x128xf32> to vector<2x32xf32>
    %294 = vector.extract_strided_slice %291 {offsets = [0, 32], sizes = [2, 32], strides = [1, 1]} : vector<2x128xf32> to vector<2x32xf32>
    %295 = vector.extract_strided_slice %292 {offsets = [0, 64], sizes = [2, 32], strides = [1, 1]} : vector<2x128xf32> to vector<2x32xf32>
    %296 = vector.extract_strided_slice %291 {offsets = [0, 96], sizes = [2, 32], strides = [1, 1]} : vector<2x128xf32> to vector<2x32xf32>
    %297 = arith.mulf %294, %263 : vector<2x32xf32>
    %298 = arith.mulf %293, %295 : vector<2x32xf32>
    %299 = arith.addf %297, %298 : vector<2x32xf32>
    %300 = math.tanh %299 : vector<2x32xf32>
    %301 = arith.mulf %296, %300 : vector<2x32xf32>
    %c0_45 = arith.constant 0 : index
    %c0_46 = arith.constant 0 : index
    %302 = vector.load %arg5[%c0_45, %c0_46] : memref<32x16xf32, #tpu.memory_space<vmem>>, vector<32x16xf32>
    %cst_47 = arith.constant dense<0.000000e+00> : vector<2x16xf32>
    %303 = tpu.matmul %286, %302, %cst_47 {dimension_numbers = #tpu.dot_dimension_numbers<[1], [0], [0], [1], [0, 0, 1, 1], [], []>} : vector<2x32xf32>, vector<32x16xf32>, vector<2x16xf32> -> vector<2x16xf32>
    %c0_48 = arith.constant 0 : index
    %c0_49 = arith.constant 0 : index
    %304 = vector.load %arg6[%c0_48, %c0_49] : memref<32x16xf32, #tpu.memory_space<vmem>>, vector<32x16xf32>
    %cst_50 = arith.constant dense<0.000000e+00> : vector<2x16xf32>
    %305 = tpu.matmul %301, %304, %cst_50 {dimension_numbers = #tpu.dot_dimension_numbers<[1], [0], [0], [1], [0, 0, 1, 1], [], []>} : vector<2x32xf32>, vector<32x16xf32>, vector<2x16xf32> -> vector<2x16xf32>
    %306 = arith.addf %303, %305 : vector<2x16xf32>
    %c0_51 = arith.constant 0 : index
    %c0_52 = arith.constant 0 : index
    %307 = vector.load %arg7[%c0_51, %c0_52] : memref<1x16xf32, #tpu.memory_space<vmem>>, vector<1x16xf32>
    %308 = vector.broadcast %307 : vector<1x16xf32> to vector<2x16xf32>
    %309 = arith.addf %306, %308 : vector<2x16xf32>
    %c0_53 = arith.constant 0 : index
    %c0_54 = arith.constant 0 : index
    %310 = vector.load %arg8[%c0_53, %c0_54] : memref<32x16xf32, #tpu.memory_space<vmem>>, vector<32x16xf32>
    %cst_55 = arith.constant dense<0.000000e+00> : vector<2x16xf32>
    %311 = tpu.matmul %286, %310, %cst_55 {dimension_numbers = #tpu.dot_dimension_numbers<[1], [0], [0], [1], [0, 0, 1, 1], [], []>} : vector<2x32xf32>, vector<32x16xf32>, vector<2x16xf32> -> vector<2x16xf32>
    %c0_56 = arith.constant 0 : index
    %c0_57 = arith.constant 0 : index
    %312 = vector.load %arg9[%c0_56, %c0_57] : memref<32x16xf32, #tpu.memory_space<vmem>>, vector<32x16xf32>
    %cst_58 = arith.constant dense<0.000000e+00> : vector<2x16xf32>
    %313 = tpu.matmul %301, %312, %cst_58 {dimension_numbers = #tpu.dot_dimension_numbers<[1], [0], [0], [1], [0, 0, 1, 1], [], []>} : vector<2x32xf32>, vector<32x16xf32>, vector<2x16xf32> -> vector<2x16xf32>
    %314 = arith.addf %311, %313 : vector<2x16xf32>
    %c0_59 = arith.constant 0 : index
    %c0_60 = arith.constant 0 : index
    %315 = vector.load %arg10[%c0_59, %c0_60] : memref<1x16xf32, #tpu.memory_space<vmem>>, vector<1x16xf32>
    %316 = vector.broadcast %315 : vector<1x16xf32> to vector<2x16xf32>
    %317 = arith.addf %314, %316 : vector<2x16xf32>
    %cst_61 = arith.constant 5.000000e-01 : f32
    %318 = vector.broadcast %cst_61 : f32 to vector<2x16xf32>
    %319 = arith.mulf %317, %318 : vector<2x16xf32>
    %320 = math.exp %319 : vector<2x16xf32>
    %c0_62 = arith.constant 0 : index
    %c0_63 = arith.constant 0 : index
    %321 = vector.load %arg11[%c0_62, %c0_63] : memref<2x16xf32, #tpu.memory_space<vmem>>, vector<2x16xf32>
    %322 = arith.mulf %320, %321 : vector<2x16xf32>
    %323 = arith.addf %309, %322 : vector<2x16xf32>
    %c0_64 = arith.constant 0 : index
    %c0_65 = arith.constant 0 : index
    %324 = vector.load %arg12[%c0_64, %c0_65] : memref<2x16xf32, #tpu.memory_space<vmem>>, vector<2x16xf32>
    tpu.vector_store %arg12[%c0_64, %c0_65], %323 {strides = array<i32>} : memref<2x16xf32, #tpu.memory_space<vmem>>, vector<2x16xf32>,
    %c0_66 = arith.constant 0 : index
    %c0_67 = arith.constant 0 : index
    %325 = vector.load %arg13[%c0_66, %c0_67] : memref<2x16xf32, #tpu.memory_space<vmem>>, vector<2x16xf32>
    tpu.vector_store %arg13[%c0_66, %c0_67], %309 {strides = array<i32>} : memref<2x16xf32, #tpu.memory_space<vmem>>, vector<2x16xf32>,
    %c0_68 = arith.constant 0 : index
    %c0_69 = arith.constant 0 : index
    %326 = vector.load %arg14[%c0_68, %c0_69] : memref<2x16xf32, #tpu.memory_space<vmem>>, vector<2x16xf32>
    tpu.vector_store %arg14[%c0_68, %c0_69], %317 {strides = array<i32>} : memref<2x16xf32, #tpu.memory_space<vmem>>, vector<2x16xf32>,
    return
  }
}

</mosaic_0001>

<bundles_post_ra>
// kernel: bilstm_encoder_forward.1
= control target key start
LH: loop header
LB: loop body
LE: loop exit
PB: predicated region body
PF: predicated region fallthrough
CT: control target
= control target key end

     0   :  { %20 = vsyncpa [#allocation3], 0  ;;  %vm62_vm0 = vcmask 64512   ;;  %v2897_v3 = vmov 0.0   ;;  %v2898_v7 = vmov 0.0|0.0   ;;  %s3395_s0 = inlined_call_operand.vmem [shape: f32[16,8], index: 0, kind: input, shape index: {}]   ;;  %s3396_s1 = inlined_call_operand.vmem [shape: f32[8,256], index: 1, kind: input, shape index: {}]   ;;  %s3397_s2 = inlined_call_operand.vmem [shape: f32[1,256], index: 2, kind: input, shape index: {}]   ;;  %s3398_s3 = inlined_call_operand.vmem [shape: f32[32,128], index: 3, kind: input, shape index: {}]   ;;  %s3399_s4 = inlined_call_operand.vmem [shape: f32[32,128], index: 4, kind: input, shape index: {}]   ;;  %s3400_s5 = inlined_call_operand.vmem [shape: f32[32,16], index: 5, kind: input, shape index: {}]   ;;  %s3401_s6 = inlined_call_operand.vmem [shape: f32[32,16], index: 6, kind: input, shape index: {}]   ;;  %s3402_s7 = inlined_call_operand.vmem [shape: f32[1,16], index: 7, kind: input, shape index: {}]   ;;  %s3403_s8 = inlined_call_operand.vmem [shape: f32[32,16], index: 8, kind: input, shape index: {}]   ;;  %s3404_s9 = inlined_call_operand.vmem [shape: f32[32,16], index: 9, kind: input, shape index: {}]   ;;  %s3405_s10 = inlined_call_operand.vmem [shape: f32[1,16], index: 10, kind: input, shape index: {}]   ;;  %s3406_s11 = inlined_call_operand.vmem [shape: f32[2,16], index: 11, kind: input, shape index: {}]   ;;  %s3407_s12 = inlined_call_operand.hbm [shape: f32[2,16], index: 12, kind: output, shape index: {0}]   ;;  %s3408_s13 = inlined_call_operand.hbm [shape: f32[2,16], index: 13, kind: output, shape index: {1}]   ;;  %s3409_s14 = inlined_call_operand.hbm [shape: f32[2,16], index: 14, kind: output, shape index: {2}]  }
   0x1   :  { %v49_v0 = vld [vmem:[%s3396_s1 + $0x8] sm:$0xff]  ;;  %v48_v1 = vld [vmem:[%s3396_s1] sm:$0xff]  ;;  %133 = vmatprep.mubr.f32.mxu0 %v2897_v3  ;;  %2569 = vmatprep.subr.bf16.mxu1 %v2898_v7  ;;  %v148_v10 = vld [vmem:[%s3398_s3 + $0x10] sm:$0xff] }
   0x2   :  { %v46_v2 = vld [vmem:[%s3395_s0] sm:$0xff]  ;;  %69 = vmatprep.subr.mxu0 %v49_v0  ;;  %v147_v5 = vld [vmem:[%s3398_s3 + $0x8] sm:$0xff]  ;;  %v149_v12 = vld [vmem:[%s3398_s3 + $0x18] sm:$0xff] }
   0x3   :  { %v146_v4 = vld [vmem:[%s3398_s3] sm:$0xff]  ;;  %70 = vmatpush1.msra.mxu0 %v48_v1  ;;  %v151_v9 = vld [vmem:[%s3399_s4 + $0x8] sm:$0xff]  ;;  %v152_v13 = vld [vmem:[%s3399_s4 + $0x10] sm:$0xff]  ;;  %v3026_v16 = vpack.c.bf16 %v149_v12, %v148_v10 }
   0x4   :  { %v150_v6 = vld [vmem:[%s3399_s4] sm:$0xff]  ;;  %v3000_v8 = vpack.c.bf16 %v147_v5, %v146_v4  ;;  %2211 = vmatmul.mubr.msk.f32.vlgmr.msra.gmra.mrb[0].mxu0 %vm62_vm0, %v46_v2  ;;  %2575 = vmatprep.subr.bf16.mxu0 %v2898_v7  ;;  %v153_v14 = vld [vmem:[%s3399_s4 + $0x18] sm:$0xff]  ;;  %v47_v15 = vld [vmem:[%s3395_s0 + $0x8] sm:$0xff] }
   0x5   :  { %v3010_v11 = vpack.c.bf16 %v151_v9, %v150_v6  ;;  %139 = vmatprep.mubr.f32.mxu0 %v2897_v3 }
   0x6   :  { %2571 = vmatpush3.bf16.msra.mxu1 %v3000_v8 }
   0x7   :  { %21 = vsyncpa [#allocation5], 0  ;;  %2577 = vmatpush3.bf16.msra.mxu0 %v3010_v11  ;;  %2572 = vmatprep.subr.bf16.mxu1 %v2898_v7  ;;  %v3030_v17 = vpack.c.bf16 %v153_v14, %v152_v13  ;;  %vm2899_vm1 = vmmov 0   ;;  %v52_v18 = vlaneseq  ;;  %v50_v21 = vld [vmem:[%s3397_s2] sm:$0x3]  ;;  %s2900_s2 = smov 64  }
   0x8   :  { %2578 = vmatprep.subr.bf16.mxu0 %v2898_v7  ;;  %2357 = vmatprep.mubr.msk.f32.mxu1 %vm2899_vm1, %v2897_v3  ;;  %s2901_s4 = smov 32   ;;  %vm154_vm2 = vcmask 261120   ;;  %s2902_s28 = smov [#allocation4]   ;;  %vm2166_vm3 = vcmask 123904  }
   0x9   :  { %2212 = vmatmul.mubr.msk.f32.gmra.mrb[2].mxu0 %vm62_vm0, %v47_v15  ;;  %v53_v19 = vshrl.u32 %v52_v18, 7  ;;  %s2186_s29 = sshll.u32 %s2902_s28, 4  ;;  %s2187_s29 = int_to_ptr.vmem [resolvable:$true] %s2186_s29 }
   0xa   :  { %2574 = vmatpush3.bf16.msra.mxu1 %v3026_v16  ;;  %2368 = vmatprep.mubr.msk.f32.mxu0 %vm2899_vm1, %v2897_v3  ;;  %s2827_s30 = scalar_lea.vmem %s2187_s29, 32  ;;  %p2832_p1 = scmp.lt.s32.totalorder %s2187_s29, %s2187_s29 }
   0xb   :  { %2580 = vmatpush3.bf16.msra.mxu0 %v3030_v17  ;;  %2581 = vmatprep.subr.bf16.mxu1 %v2898_v7  ;;  %v58_v20 = vsub.s32 1, %v53_v19  ;;  %v54_v23 = vsub.s32 0, %v53_v19  ;;  %p2828_p0 = scmp.ne.s32.totalorder %s2187_s29, %s2827_s30  ;;  %p2833_p2 = scmp.lt.s32.totalorder %s2827_s30, %s2827_s30 }
   0xc   :  { %2587 = vmatprep.subr.bf16.mxu0 %v2898_v7 }
   0xd   :  { %2358 = vmatmul.mubr.f32.vlgmr.msra.gmra.mrb[0].mxu1 %v2897_v3  ;;  %v59_v22 = vrot.slane %v50_v21, %v58_v20  ;;  %v55_v27 = vrot.slane %v50_v21, %v54_v23  ;;  %p2834_p3 = por %p2833_p2, %p2832_p1 }
   0xe   :  { %2369 = vmatmul.mubr.f32.vlgmr.msra.gmra.mrb[4].mxu0 %v2897_v3  ;;  %2583 = vmatpush3.bf16.msra.mxu1 %v3000_v8 }
   0xf   :  { %2584 = vmatprep.subr.bf16.mxu1 %v2898_v7  ;;  %2379 = vmatprep.mubr.msk.f32.mxu1 %vm2899_vm1, %v2897_v3  ;;  %p2835_p4 = pnand %p2834_p3, %p2828_p0 }
  0x10   :  { %2589 = vmatpush3.bf16.msra.mxu0 %v3010_v11  ;;  %2390 = vmatprep.mubr.msk.f32.mxu0 %vm2899_vm1, %v2897_v3 }
  0x11   :  { %2590 = vmatprep.subr.bf16.mxu0 %v2898_v7 }
  0x12   :  { %2586 = vmatpush3.bf16.msra.mxu1 %v3026_v16 }
  0x13   :  { %2593 = vmatprep.subr.bf16.mxu1 %v2898_v7 }
  0x14   :  { %2592 = vmatpush3.bf16.msra.mxu0 %v3030_v17 }
  0x15   :  { %2599 = vmatprep.subr.bf16.mxu0 %v2898_v7 }
  0xd7   :  { %v135_v24 = vpop.f32.mrb[0].mxu0 }
  0xd8   :  { %v137_v25 = vpop.f32.mrb[1].mxu0  ;;  %v3063_v31 = vadd.f32 %v135_v24, %v55_v27 }
  0xd9   :  { %v3059_v26 = vadd.f32 %v137_v25, %v59_v22 }
  0xdc   :  { %v141_v28 = vpop.f32.mrb[2].mxu0 }
  0xdd   :  { %v3061_v29 = vadd.f32 %v141_v28, %v55_v27  ;;  %v143_v30 = vpop.f32.mrb[3].mxu0 }
  0xde   :  { %v3066_v36 = vadd.f32 %v143_v30, %v59_v22 }
  0xe0   :  { %v224_v32 = vpop.f32.mrb[0].mxu1 }
  0xe1   :  { %v228_v33 = vadd.f32 %v224_v32, %v3063_v31  ;;  %v2359_v34 = vpop.f32.mrb[1].mxu1  ;;  %v295_v35 = vpop.f32.mrb[4].mxu0 }
  0xe2   :  { %v300_v37 = vrot.slane %v295_v35, 2  ;;  %v2370_v38 = vpop.f32.mrb[5].mxu0 }
  0xe3   :  { %2697 = vtanh.f32 %v228_v33  ;;  %v2213_v42 = vmul.f32 -1.442695, %v228_v33 }
  0xe4   :  { %v302_v39 = vadd.f32 %v300_v37, %v3066_v36 }
  0xe6   :  { %2699 = vtanh.f32 %v302_v39  ;;  %v2214_v43 = vmul.f32 -1.442695, %v302_v39 }
  0xe7   :  { %2701 = vpow2.f32 %v2213_v42 }
  0xe8   :  { %2703 = vpow2.f32 %v2214_v43 }
  0xed   :  { %v2698_v40 = vpop.eup %2697 }
  0xee   :  { %312 = vrot.lane.b32.xlu0 %v2698_v40, %s2900_s2 }
  0xf0   :  { %v2700_v41 = vpop.eup %2699 }
  0xf1   :  { %v2702_v44 = vpop.eup %2701 }
  0xf2   :  { %336 = vrot.lane.b32.xlu0 %v2700_v41, %s2900_s2  ;;  %v306_v45 = vadd.f32 1.0, %v2702_v44  ;;  %v2704_v46 = vpop.eup %2703 }
  0xf3   :  { %v330_v47 = vadd.f32 1.0, %v2704_v46 }
  0xf4   :  { %2705 = vrcp.f32 %v306_v45 }
  0xf5   :  { %2707 = vrcp.f32 %v330_v47 }
  0xfe   :  { %v2706_v48 = vpop.eup %2705 }
  0xff   :  { %v2708_v51 = vpop.eup %2707  ;;  %v310_v54 = vmul.f32 0.0, %v2706_v48 }
 0x100   :  { %v334_v57 = vmul.f32 0.0, %v2708_v51 }
 0x160   :  { %v313_v49 = vpop.permute.xlu0 %312 }
 0x161   :  { %v315_v50 = vmul.f32 %v2706_v48, %v313_v49 }
 0x163   :  { %317 = vrot.lane.b32.xlu1 %v315_v50, %s2901_s4 }
 0x164   :  { %v337_v52 = vpop.permute.xlu0 %336 }
 0x165   :  { %v339_v53 = vmul.f32 %v2708_v51, %v337_v52 }
 0x167   :  { %341 = vrot.lane.b32.xlu1 %v339_v53, %s2901_s4 }
 0x1d5   :  { %v318_v55 = vpop.permute.xlu1 %317 }
 0x1d6   :  { %v3073_v56 = vadd.f32 %v318_v55, %v310_v54 }
 0x1d8   :  { %2709 = vtanh.f32 %v3073_v56  ;;  %v518_v37 = vrot.slane %v3073_v56, 6 }
 0x1d9   :  { %v342_v58 = vpop.permute.xlu1 %341 }
 0x1da   :  { %v3076_v59 = vadd.f32 %v342_v58, %v334_v57 }
 0x1dc   :  { %2711 = vtanh.f32 %v3076_v59  ;;  %v545_v41 = vrot.slane %v3076_v59, 2 }
 0x1e2   :  { %v2710_v60 = vpop.eup %2709 }
 0x1e3   :  { %323 = vrot.lane.b32.xlu0 %v2710_v60, %s2900_s2 }
 0x1e6   :  { %v2712_v61 = vpop.eup %2711 }
 0x1e7   :  { %347 = vrot.lane.b32.xlu1 %v2712_v61, %s2900_s2 }
 0x255   :  { %v324_v62 = vpop.permute.xlu0 %323 }
 0x256   :  { %v326_v63 = vmul.f32 %v2706_v48, %v324_v62 }
 0x258   :  { %352 = vrot.lane.b32.xlu0 %v326_v63, %s2901_s4 }
 0x259   :  { %v348_v0 = vpop.permute.xlu1 %347 }
 0x25a   :  { %v350_v1 = vmul.f32 %v2708_v51, %v348_v0 }
 0x25c   :  { %v431_v2 = vrot.slane %v350_v1, 6 }
 0x25e   :  { %432 = vrot.lane.b32.xlu1 %v431_v2, %s2901_s4 }
 0x2ca   :  { %v353_v4 = vpop.permute.xlu0 %352 }
 0x2cb   :  { %2380 = vmatmul.mubr.msk.f32.vlgmr.msra.gmra.mrb[2].mxu1 %vm154_vm2, %v353_v4 }
 0x2cc   :  { %2595 = vmatpush3.bf16.msra.mxu1 %v3000_v8  ;;  %2401 = vmatprep.mubr.msk.f32.mxu1 %vm2899_vm1, %v2897_v3 }
 0x2cd   :  { %2596 = vmatprep.subr.bf16.mxu1 %v2898_v7 }
 0x2d0   :  { %v433_v5 = vpop.permute.xlu1 %432  ;;  %2598 = vmatpush3.bf16.msra.mxu1 %v3026_v16 }
 0x2d1   :  { %2391 = vmatmul.mubr.msk.f32.vlgmr.msra.gmra.mrb[6].mxu0 %vm154_vm2, %v433_v5  ;;  %2605 = vmatprep.subr.bf16.mxu1 %v2898_v7 }
 0x2d2   :  { %2601 = vmatpush3.bf16.msra.mxu0 %v3010_v11  ;;  %2412 = vmatprep.mubr.msk.f32.mxu0 %vm2899_vm1, %v2897_v3 }
 0x2d3   :  { %2602 = vmatprep.subr.bf16.mxu0 %v2898_v7 }
 0x2d6   :  { %2604 = vmatpush3.bf16.msra.mxu0 %v3030_v17 }
 0x2d7   :  { %2611 = vmatprep.subr.bf16.mxu0 %v2898_v7 }
 0x39e   :  { %v422_v6 = vpop.f32.mrb[2].mxu1 }
 0x39f   :  { %v427_v9 = vrot.slane %v422_v6, 6  ;;  %v2381_v10 = vpop.f32.mrb[3].mxu1 }
 0x3a1   :  { %v429_v12 = vadd.f32 %v427_v9, %v3063_v31 }
 0x3a3   :  { %2713 = vtanh.f32 %v429_v12  ;;  %v2217_v21 = vmul.f32 -1.442695, %v429_v12 }
 0x3a4   :  { %v502_v13 = vpop.f32.mrb[6].mxu0 }
 0x3a5   :  { %v507_v14 = vrot.slane %v502_v13, 4  ;;  %v2392_v15 = vpop.f32.mrb[7].mxu0 }
 0x3a7   :  { %v509_v18 = vadd.f32 %v507_v14, %v3066_v36 }
 0x3a9   :  { %2715 = vtanh.f32 %v509_v18  ;;  %v2218_v22 = vmul.f32 -1.442695, %v509_v18 }
 0x3aa   :  { %2717 = vpow2.f32 %v2217_v21 }
 0x3ab   :  { %2719 = vpow2.f32 %v2218_v22 }
 0x3ad   :  { %v2714_v19 = vpop.eup %2713 }
 0x3ae   :  { %522 = vrot.lane.b32.xlu0 %v2714_v19, %s2900_s2 }
 0x3b3   :  { %v2716_v20 = vpop.eup %2715 }
 0x3b4   :  { %549 = vrot.lane.b32.xlu1 %v2716_v20, %s2900_s2  ;;  %v2718_v23 = vpop.eup %2717 }
 0x3b5   :  { %v513_v24 = vadd.f32 1.0, %v2718_v23  ;;  %v2720_v25 = vpop.eup %2719 }
 0x3b6   :  { %v540_v27 = vadd.f32 1.0, %v2720_v25 }
 0x3b7   :  { %2721 = vrcp.f32 %v513_v24 }
 0x3b8   :  { %2723 = vrcp.f32 %v540_v27 }
 0x3c1   :  { %v2722_v28 = vpop.eup %2721 }
 0x3c2   :  { %v2724_v33 = vpop.eup %2723  ;;  %v520_v38 = vmul.f32 %v2722_v28, %v518_v37 }
 0x3c3   :  { %v547_v42 = vmul.f32 %v2724_v33, %v545_v41 }
 0x420   :  { %v523_v30 = vpop.permute.xlu0 %522 }
 0x421   :  { %v525_v32 = vmul.f32 %v2722_v28, %v523_v30 }
 0x423   :  { %527 = vrot.lane.b32.xlu0 %v525_v32, %s2901_s4 }
 0x426   :  { %v550_v34 = vpop.permute.xlu1 %549 }
 0x427   :  { %v552_v35 = vmul.f32 %v2724_v33, %v550_v34 }
 0x429   :  { %554 = vrot.lane.b32.xlu1 %v552_v35, %s2901_s4 }
 0x495   :  { %v528_v39 = vpop.permute.xlu0 %527 }
 0x496   :  { %v3104_v40 = vadd.f32 %v528_v39, %v520_v38 }
 0x498   :  { %2725 = vtanh.f32 %v3104_v40  ;;  %v732_v19 = vrot.slane %v3104_v40, 6 }
 0x49b   :  { %v555_v43 = vpop.permute.xlu1 %554 }
 0x49c   :  { %v3108_v44 = vadd.f32 %v555_v43, %v547_v42 }
 0x49e   :  { %2727 = vtanh.f32 %v3108_v44  ;;  %v759_v23 = vrot.slane %v3108_v44, 2 }
 0x4a2   :  { %v2726_v45 = vpop.eup %2725 }
 0x4a3   :  { %533 = vrot.lane.b32.xlu0 %v2726_v45, %s2900_s2 }
 0x4a8   :  { %v2728_v46 = vpop.eup %2727 }
 0x4a9   :  { %560 = vrot.lane.b32.xlu1 %v2728_v46, %s2900_s2 }
 0x515   :  { %v534_v47 = vpop.permute.xlu0 %533 }
 0x516   :  { %v536_v48 = vmul.f32 %v2722_v28, %v534_v47 }
 0x518   :  { %v565_v49 = vrot.slane %v536_v48, 2 }
 0x51a   :  { %566 = vrot.lane.b32.xlu0 %v565_v49, %s2901_s4 }
 0x51b   :  { %v561_v50 = vpop.permute.xlu1 %560 }
 0x51c   :  { %v563_v51 = vmul.f32 %v2724_v33, %v561_v50 }
 0x51e   :  { %v645_v52 = vrot.slane %v563_v51, 4 }
 0x520   :  { %646 = vrot.lane.b32.xlu1 %v645_v52, %s2901_s4 }
 0x58c   :  { %v567_v53 = vpop.permute.xlu0 %566 }
 0x58d   :  { %2402 = vmatmul.mubr.msk.f32.vlgmr.msra.gmra.mrb[4].mxu1 %vm154_vm2, %v567_v53 }
 0x58e   :  { %2607 = vmatpush3.bf16.msra.mxu1 %v3000_v8  ;;  %2423 = vmatprep.mubr.msk.f32.mxu1 %vm2899_vm1, %v2897_v3 }
 0x58f   :  { %2608 = vmatprep.subr.bf16.mxu1 %v2898_v7 }
 0x592   :  { %v647_v54 = vpop.permute.xlu1 %646  ;;  %2610 = vmatpush3.bf16.msra.mxu1 %v3026_v16 }
 0x593   :  { %2413 = vmatmul.mubr.msk.f32.vlgmr.msra.gmra.mrb[8].mxu0 %vm154_vm2, %v647_v54  ;;  %2617 = vmatprep.subr.bf16.mxu1 %v2898_v7 }
 0x594   :  { %2613 = vmatpush3.bf16.msra.mxu0 %v3010_v11  ;;  %2434 = vmatprep.mubr.msk.f32.mxu0 %vm2899_vm1, %v2897_v3 }
 0x595   :  { %2614 = vmatprep.subr.bf16.mxu0 %v2898_v7 }
 0x598   :  { %2616 = vmatpush3.bf16.msra.mxu0 %v3030_v17 }
 0x599   :  { %2623 = vmatprep.subr.bf16.mxu0 %v2898_v7 }
 0x660   :  { %v636_v55 = vpop.f32.mrb[4].mxu1 }
 0x661   :  { %v641_v56 = vrot.slane %v636_v55, 4  ;;  %v2403_v57 = vpop.f32.mrb[5].mxu1 }
 0x663   :  { %v643_v58 = vadd.f32 %v641_v56, %v3063_v31 }
 0x665   :  { %2729 = vtanh.f32 %v643_v58  ;;  %v2221_v1 = vmul.f32 -1.442695, %v643_v58 }
 0x666   :  { %v716_v59 = vpop.f32.mrb[8].mxu0 }
 0x667   :  { %v721_v60 = vrot.slane %v716_v59, 6  ;;  %v2414_v61 = vpop.f32.mrb[9].mxu0 }
 0x669   :  { %v723_v62 = vadd.f32 %v721_v60, %v3066_v36 }
 0x66b   :  { %2731 = vtanh.f32 %v723_v62  ;;  %v2222_v2 = vmul.f32 -1.442695, %v723_v62 }
 0x66c   :  { %2733 = vpow2.f32 %v2221_v1 }
 0x66d   :  { %2735 = vpow2.f32 %v2222_v2 }
 0x66f   :  { %v2730_v63 = vpop.eup %2729 }
 0x670   :  { %736 = vrot.lane.b32.xlu0 %v2730_v63, %s2900_s2 }
 0x675   :  { %v2732_v0 = vpop.eup %2731 }
 0x676   :  { %763 = vrot.lane.b32.xlu1 %v2732_v0, %s2900_s2  ;;  %v2734_v4 = vpop.eup %2733 }
 0x677   :  { %v727_v5 = vadd.f32 1.0, %v2734_v4  ;;  %v2736_v6 = vpop.eup %2735 }
 0x678   :  { %v754_v9 = vadd.f32 1.0, %v2736_v6 }
 0x679   :  { %2737 = vrcp.f32 %v727_v5 }
 0x67a   :  { %2739 = vrcp.f32 %v754_v9 }
 0x683   :  { %v2738_v10 = vpop.eup %2737 }
 0x684   :  { %v2740_v14 = vpop.eup %2739  ;;  %v734_v20 = vmul.f32 %v2738_v10, %v732_v19 }
 0x685   :  { %v761_v24 = vmul.f32 %v2740_v14, %v759_v23 }
 0x6e2   :  { %v737_v12 = vpop.permute.xlu0 %736 }
 0x6e3   :  { %v739_v13 = vmul.f32 %v2738_v10, %v737_v12 }
 0x6e5   :  { %741 = vrot.lane.b32.xlu0 %v739_v13, %s2901_s4 }
 0x6e8   :  { %v764_v15 = vpop.permute.xlu1 %763 }
 0x6e9   :  { %v766_v18 = vmul.f32 %v2740_v14, %v764_v15 }
 0x6eb   :  { %768 = vrot.lane.b32.xlu1 %v766_v18, %s2901_s4 }
 0x757   :  { %v742_v21 = vpop.permute.xlu0 %741 }
 0x758   :  { %v3136_v22 = vadd.f32 %v742_v21, %v734_v20 }
 0x75a   :  { %2741 = vtanh.f32 %v3136_v22  ;;  %v943_v60 = vrot.slane %v3136_v22, 6 }
 0x75d   :  { %v769_v25 = vpop.permute.xlu1 %768 }
 0x75e   :  { %v3140_v27 = vadd.f32 %v769_v25, %v761_v24 }
 0x760   :  { %2743 = vtanh.f32 %v3140_v27  ;;  %v970_v63 = vrot.slane %v3140_v27, 2 }
 0x764   :  { %v2742_v28 = vpop.eup %2741 }
 0x765   :  { %747 = vrot.lane.b32.xlu0 %v2742_v28, %s2900_s2 }
 0x76a   :  { %v2744_v30 = vpop.eup %2743 }
 0x76b   :  { %774 = vrot.lane.b32.xlu1 %v2744_v30, %s2900_s2 }
 0x7d7   :  { %v748_v32 = vpop.permute.xlu0 %747 }
 0x7d8   :  { %v750_v33 = vmul.f32 %v2738_v10, %v748_v32 }
 0x7da   :  { %v779_v34 = vrot.slane %v750_v33, 4 }
 0x7dc   :  { %780 = vrot.lane.b32.xlu0 %v779_v34, %s2901_s4 }
 0x7dd   :  { %v775_v35 = vpop.permute.xlu1 %774 }
 0x7de   :  { %v777_v37 = vmul.f32 %v2740_v14, %v775_v35 }
 0x7e0   :  { %v859_v38 = vrot.slane %v777_v37, 2 }
 0x7e2   :  { %860 = vrot.lane.b32.xlu1 %v859_v38, %s2901_s4 }
 0x84e   :  { %v781_v39 = vpop.permute.xlu0 %780 }
 0x84f   :  { %2424 = vmatmul.mubr.msk.f32.vlgmr.msra.gmra.mrb[6].mxu1 %vm154_vm2, %v781_v39 }
 0x850   :  { %2619 = vmatpush3.bf16.msra.mxu1 %v3000_v8  ;;  %2445 = vmatprep.mubr.msk.f32.mxu1 %vm2899_vm1, %v2897_v3 }
 0x851   :  { %2620 = vmatprep.subr.bf16.mxu1 %v2898_v7 }
 0x854   :  { %v861_v40 = vpop.permute.xlu1 %860  ;;  %2622 = vmatpush3.bf16.msra.mxu1 %v3026_v16 }
 0x855   :  { %2435 = vmatmul.mubr.msk.f32.vlgmr.msra.gmra.mrb[10].mxu0 %vm154_vm2, %v861_v40  ;;  %2629 = vmatprep.subr.bf16.mxu1 %v2898_v7 }
 0x856   :  { %2625 = vmatpush3.bf16.msra.mxu0 %v3010_v11  ;;  %2456 = vmatprep.mubr.msk.f32.mxu0 %vm2899_vm1, %v2897_v3 }
 0x857   :  { %2626 = vmatprep.subr.bf16.mxu0 %v2898_v7 }
 0x85a   :  { %2628 = vmatpush3.bf16.msra.mxu0 %v3030_v17 }
 0x85b   :  { %2635 = vmatprep.subr.bf16.mxu0 %v2898_v7 }
 0x922   :  { %v850_v41 = vpop.f32.mrb[6].mxu1 }
 0x923   :  { %v855_v42 = vrot.slane %v850_v41, 2  ;;  %v2425_v43 = vpop.f32.mrb[7].mxu1 }
 0x925   :  { %v857_v44 = vadd.f32 %v855_v42, %v3063_v31 }
 0x927   :  { %2745 = vtanh.f32 %v857_v44  ;;  %v2225_v50 = vmul.f32 -1.442695, %v857_v44 }
 0x928   :  { %v930_v45 = vpop.f32.mrb[10].mxu0 }
 0x929   :  { %v934_v46 = vadd.f32 %v930_v45, %v3066_v36  ;;  %v2436_v47 = vpop.f32.mrb[11].mxu0 }
 0x92b   :  { %2747 = vtanh.f32 %v934_v46  ;;  %v2226_v51 = vmul.f32 -1.442695, %v934_v46 }
 0x92c   :  { %2749 = vpow2.f32 %v2225_v50 }
 0x92d   :  { %2751 = vpow2.f32 %v2226_v51 }
 0x931   :  { %v2746_v48 = vpop.eup %2745 }
 0x932   :  { %947 = vrot.lane.b32.xlu0 %v2746_v48, %s2900_s2 }
 0x935   :  { %v2748_v49 = vpop.eup %2747 }
 0x936   :  { %974 = vrot.lane.b32.xlu1 %v2748_v49, %s2900_s2  ;;  %v2750_v52 = vpop.eup %2749 }
 0x937   :  { %v938_v53 = vadd.f32 1.0, %v2750_v52  ;;  %v2752_v54 = vpop.eup %2751 }
 0x938   :  { %v965_v31 = vadd.f32 1.0, %v2752_v54 }
 0x939   :  { %2753 = vrcp.f32 %v938_v53 }
 0x93a   :  { %2755 = vrcp.f32 %v965_v31 }
 0x943   :  { %v2754_v55 = vpop.eup %2753 }
 0x944   :  { %v2756_v57 = vpop.eup %2755  ;;  %v945_v61 = vmul.f32 %v2754_v55, %v943_v60 }
 0x945   :  { %v972_v1 = vmul.f32 %v2756_v57, %v970_v63 }
 0x9a4   :  { %v948_v36 = vpop.permute.xlu0 %947 }
 0x9a5   :  { %v950_v56 = vmul.f32 %v2754_v55, %v948_v36 }
 0x9a7   :  { %952 = vrot.lane.b32.xlu0 %v950_v56, %s2901_s4 }
 0x9a8   :  { %v975_v58 = vpop.permute.xlu1 %974 }
 0x9a9   :  { %v977_v59 = vmul.f32 %v2756_v57, %v975_v58 }
 0x9ab   :  { %979 = vrot.lane.b32.xlu1 %v977_v59, %s2901_s4 }
 0xa19   :  { %v953_v62 = vpop.permute.xlu0 %952 }
 0xa1a   :  { %v3169_v0 = vadd.f32 %v953_v62, %v945_v61 }
 0xa1c   :  { %2757 = vtanh.f32 %v3169_v0  ;;  %v1153_v44 = vrot.slane %v3169_v0, 6 }
 0xa1d   :  { %v980_v2 = vpop.permute.xlu1 %979 }
 0xa1e   :  { %v3172_v4 = vadd.f32 %v980_v2, %v972_v1 }
 0xa20   :  { %2759 = vtanh.f32 %v3172_v4  ;;  %v1180_v47 = vrot.slane %v3172_v4, 2 }
 0xa26   :  { %v2758_v5 = vpop.eup %2757 }
 0xa27   :  { %958 = vrot.lane.b32.xlu0 %v2758_v5, %s2900_s2 }
 0xa2a   :  { %v2760_v6 = vpop.eup %2759 }
 0xa2b   :  { %985 = vrot.lane.b32.xlu1 %v2760_v6, %s2900_s2 }
 0xa99   :  { %v959_v9 = vpop.permute.xlu0 %958 }
 0xa9a   :  { %v961_v10 = vmul.f32 %v2754_v55, %v959_v9 }
 0xa9c   :  { %v990_v12 = vrot.slane %v961_v10, 6 }
 0xa9d   :  { %v986_v13 = vpop.permute.xlu1 %985 }
 0xa9e   :  { %v988_v14 = vmul.f32 %v2756_v57, %v986_v13  ;;  %991 = vrot.lane.b32.xlu0 %v990_v12, %s2901_s4 }
 0xaa0   :  { %1067 = vrot.lane.b32.xlu1 %v988_v14, %s2901_s4 }
 0xb10   :  { %v992_v15 = vpop.permute.xlu0 %991 }
 0xb11   :  { %2446 = vmatmul.mubr.msk.f32.vlgmr.msra.gmra.mrb[8].mxu1 %vm154_vm2, %v992_v15 }
 0xb12   :  { %v1068_v18 = vpop.permute.xlu1 %1067  ;;  %2631 = vmatpush3.bf16.msra.mxu1 %v3000_v8  ;;  %2467 = vmatprep.mubr.msk.f32.mxu1 %vm2899_vm1, %v2897_v3 }
 0xb13   :  { %2457 = vmatmul.mubr.msk.f32.vlgmr.msra.gmra.mrb[12].mxu0 %vm154_vm2, %v1068_v18  ;;  %2632 = vmatprep.subr.bf16.mxu1 %v2898_v7 }
 0xb14   :  { %2637 = vmatpush3.bf16.msra.mxu0 %v3010_v11  ;;  %2478 = vmatprep.mubr.msk.f32.mxu0 %vm2899_vm1, %v2897_v3 }
 0xb15   :  { %2638 = vmatprep.subr.bf16.mxu0 %v2898_v7 }
 0xb16   :  { %2634 = vmatpush3.bf16.msra.mxu1 %v3026_v16 }
 0xb17   :  { %2641 = vmatprep.subr.bf16.mxu1 %v2898_v7 }
 0xb18   :  { %2640 = vmatpush3.bf16.msra.mxu0 %v3030_v17 }
 0xb19   :  { %2647 = vmatprep.subr.bf16.mxu0 %v2898_v7 }
 0xbe4   :  { %v1061_v19 = vpop.f32.mrb[8].mxu1 }
 0xbe5   :  { %v1065_v20 = vadd.f32 %v1061_v19, %v3061_v29  ;;  %v2447_v21 = vpop.f32.mrb[9].mxu1 }
 0xbe6   :  { %v1137_v22 = vpop.f32.mrb[12].mxu0 }
 0xbe7   :  { %2761 = vtanh.f32 %v1065_v20  ;;  %v1142_v23 = vrot.slane %v1137_v22, 2  ;;  %v2458_v24 = vpop.f32.mrb[13].mxu0  ;;  %v2229_v30 = vmul.f32 -1.442695, %v1065_v20 }
 0xbe9   :  { %v1144_v25 = vadd.f32 %v1142_v23, %v3059_v26 }
 0xbeb   :  { %2763 = vtanh.f32 %v1144_v25  ;;  %v2230_v32 = vmul.f32 -1.442695, %v1144_v25 }
 0xbec   :  { %2765 = vpow2.f32 %v2229_v30 }
 0xbed   :  { %2767 = vpow2.f32 %v2230_v32 }
 0xbf1   :  { %v2762_v27 = vpop.eup %2761 }
 0xbf2   :  { %1157 = vrot.lane.b32.xlu0 %v2762_v27, %s2900_s2 }
 0xbf5   :  { %v2764_v28 = vpop.eup %2763 }
 0xbf6   :  { %1184 = vrot.lane.b32.xlu1 %v2764_v28, %s2900_s2  ;;  %v2766_v33 = vpop.eup %2765 }
 0xbf7   :  { %v1148_v34 = vadd.f32 1.0, %v2766_v33  ;;  %v2768_v35 = vpop.eup %2767 }
 0xbf8   :  { %v1175_v37 = vadd.f32 1.0, %v2768_v35 }
 0xbf9   :  { %2769 = vrcp.f32 %v1148_v34 }
 0xbfa   :  { %2771 = vrcp.f32 %v1175_v37 }
 0xc03   :  { %v2770_v38 = vpop.eup %2769 }
 0xc04   :  { %v2772_v41 = vpop.eup %2771  ;;  %v1155_v45 = vmul.f32 %v2770_v38, %v1153_v44 }
 0xc05   :  { %v1182_v49 = vmul.f32 %v2772_v41, %v1180_v47 }
 0xc64   :  { %v1158_v39 = vpop.permute.xlu0 %1157 }
 0xc65   :  { %v1160_v40 = vmul.f32 %v2770_v38, %v1158_v39 }
 0xc67   :  { %1162 = vrot.lane.b32.xlu0 %v1160_v40, %s2901_s4 }
 0xc68   :  { %v1185_v42 = vpop.permute.xlu1 %1184 }
 0xc69   :  { %v1187_v43 = vmul.f32 %v2772_v41, %v1185_v42 }
 0xc6b   :  { %1189 = vrot.lane.b32.xlu1 %v1187_v43, %s2901_s4 }
 0xcd9   :  { %v1163_v46 = vpop.permute.xlu0 %1162 }
 0xcda   :  { %v3201_v48 = vadd.f32 %v1163_v46, %v1155_v45 }
 0xcdc   :  { %2773 = vtanh.f32 %v3201_v48  ;;  %v1366_v23 = vrot.slane %v3201_v48, 6 }
 0xcdd   :  { %v1190_v50 = vpop.permute.xlu1 %1189 }
 0xcde   :  { %v3204_v51 = vadd.f32 %v1190_v50, %v1182_v49 }
 0xce0   :  { %2775 = vtanh.f32 %v3204_v51  ;;  %v1393_v28 = vrot.slane %v3204_v51, 2 }
 0xce6   :  { %v2774_v52 = vpop.eup %2773 }
 0xce7   :  { %1168 = vrot.lane.b32.xlu0 %v2774_v52, %s2900_s2 }
 0xcea   :  { %v2776_v53 = vpop.eup %2775 }
 0xceb   :  { %1195 = vrot.lane.b32.xlu1 %v2776_v53, %s2900_s2 }
 0xd59   :  { %v1169_v54 = vpop.permute.xlu0 %1168 }
 0xd5a   :  { %v1171_v31 = vmul.f32 %v2770_v38, %v1169_v54 }
 0xd5c   :  { %1200 = vrot.lane.b32.xlu0 %v1171_v31, %s2901_s4 }
 0xd5d   :  { %v1196_v55 = vpop.permute.xlu1 %1195 }
 0xd5e   :  { %v1198_v36 = vmul.f32 %v2772_v41, %v1196_v55 }
 0xd60   :  { %v1279_v56 = vrot.slane %v1198_v36, 6 }
 0xd62   :  { %1280 = vrot.lane.b32.xlu1 %v1279_v56, %s2901_s4 }
 0xdce   :  { %v1201_v57 = vpop.permute.xlu0 %1200 }
 0xdcf   :  { %2468 = vmatmul.mubr.msk.f32.vlgmr.msra.gmra.mrb[10].mxu1 %vm154_vm2, %v1201_v57 }
 0xdd0   :  { %2643 = vmatpush3.bf16.msra.mxu1 %v3000_v8  ;;  %2489 = vmatprep.mubr.msk.f32.mxu1 %vm2899_vm1, %v2897_v3 }
 0xdd1   :  { %2644 = vmatprep.subr.bf16.mxu1 %v2898_v7 }
 0xdd4   :  { %v1281_v58 = vpop.permute.xlu1 %1280  ;;  %2646 = vmatpush3.bf16.msra.mxu1 %v3026_v16 }
 0xdd5   :  { %2479 = vmatmul.mubr.msk.f32.vlgmr.msra.gmra.mrb[14].mxu0 %vm154_vm2, %v1281_v58  ;;  %2653 = vmatprep.subr.bf16.mxu1 %v2898_v7 }
 0xdd6   :  { %2649 = vmatpush3.bf16.msra.mxu0 %v3010_v11  ;;  %2500 = vmatprep.mubr.msk.f32.mxu0 %vm2899_vm1, %v2897_v3 }
 0xdd7   :  { %2650 = vmatprep.subr.bf16.mxu0 %v2898_v7 }
 0xdda   :  { %2652 = vmatpush3.bf16.msra.mxu0 %v3030_v17 }
 0xddb   :  { %2659 = vmatprep.subr.bf16.mxu0 %v2898_v7 }
 0xea2   :  { %v1270_v59 = vpop.f32.mrb[10].mxu1 }
 0xea3   :  { %v1275_v60 = vrot.slane %v1270_v59, 6  ;;  %v2469_v61 = vpop.f32.mrb[11].mxu1 }
 0xea5   :  { %v1277_v62 = vadd.f32 %v1275_v60, %v3061_v29 }
 0xea7   :  { %2777 = vtanh.f32 %v1277_v62  ;;  %v2233_v6 = vmul.f32 -1.442695, %v1277_v62 }
 0xea8   :  { %v1350_v63 = vpop.f32.mrb[14].mxu0 }
 0xea9   :  { %v1355_v0 = vrot.slane %v1350_v63, 4  ;;  %v2480_v1 = vpop.f32.mrb[15].mxu0 }
 0xeab   :  { %v1357_v2 = vadd.f32 %v1355_v0, %v3059_v26 }
 0xead   :  { %2779 = vtanh.f32 %v1357_v2  ;;  %v2234_v9 = vmul.f32 -1.442695, %v1357_v2 }
 0xeae   :  { %2781 = vpow2.f32 %v2233_v6 }
 0xeaf   :  { %2783 = vpow2.f32 %v2234_v9 }
 0xeb1   :  { %v2778_v4 = vpop.eup %2777 }
 0xeb2   :  { %1370 = vrot.lane.b32.xlu0 %v2778_v4, %s2900_s2 }
 0xeb7   :  { %v2780_v5 = vpop.eup %2779 }
 0xeb8   :  { %1397 = vrot.lane.b32.xlu1 %v2780_v5, %s2900_s2  ;;  %v2782_v10 = vpop.eup %2781 }
 0xeb9   :  { %v1361_v12 = vadd.f32 1.0, %v2782_v10  ;;  %v2784_v13 = vpop.eup %2783 }
 0xeba   :  { %v1388_v14 = vadd.f32 1.0, %v2784_v13 }
 0xebb   :  { %2785 = vrcp.f32 %v1361_v12 }
 0xebc   :  { %2787 = vrcp.f32 %v1388_v14 }
 0xec5   :  { %v2786_v15 = vpop.eup %2785 }
 0xec6   :  { %v2788_v20 = vpop.eup %2787  ;;  %v1368_v24 = vmul.f32 %v2786_v15, %v1366_v23 }
 0xec7   :  { %v1395_v30 = vmul.f32 %v2788_v20, %v1393_v28 }
 0xf24   :  { %v1371_v18 = vpop.permute.xlu0 %1370 }
 0xf25   :  { %v1373_v19 = vmul.f32 %v2786_v15, %v1371_v18 }
 0xf27   :  { %1375 = vrot.lane.b32.xlu0 %v1373_v19, %s2901_s4 }
 0xf2a   :  { %v1398_v21 = vpop.permute.xlu1 %1397 }
 0xf2b   :  { %v1400_v22 = vmul.f32 %v2788_v20, %v1398_v21 }
 0xf2d   :  { %1402 = vrot.lane.b32.xlu1 %v1400_v22, %s2901_s4 }
 0xf99   :  { %v1376_v25 = vpop.permute.xlu0 %1375 }
 0xf9a   :  { %v3232_v27 = vadd.f32 %v1376_v25, %v1368_v24 }
 0xf9c   :  { %2789 = vtanh.f32 %v3232_v27  ;;  %v1580_v61 = vrot.slane %v3232_v27, 6 }
 0xf9f   :  { %v1403_v32 = vpop.permute.xlu1 %1402 }
 0xfa0   :  { %v3236_v33 = vadd.f32 %v1403_v32, %v1395_v30 }
 0xfa2   :  { %2791 = vtanh.f32 %v3236_v33  ;;  %v1607_v1 = vrot.slane %v3236_v33, 2 }
 0xfa6   :  { %v2790_v34 = vpop.eup %2789 }
 0xfa7   :  { %1381 = vrot.lane.b32.xlu0 %v2790_v34, %s2900_s2 }
 0xfac   :  { %v2792_v35 = vpop.eup %2791 }
 0xfad   :  { %1408 = vrot.lane.b32.xlu1 %v2792_v35, %s2900_s2 }
0x1019   :  { %v1382_v37 = vpop.permute.xlu0 %1381 }
0x101a   :  { %v1384_v38 = vmul.f32 %v2786_v15, %v1382_v37 }
0x101c   :  { %v1413_v39 = vrot.slane %v1384_v38, 2 }
0x101e   :  { %1414 = vrot.lane.b32.xlu0 %v1413_v39, %s2901_s4 }
0x101f   :  { %v1409_v40 = vpop.permute.xlu1 %1408 }
0x1020   :  { %v1411_v41 = vmul.f32 %v2788_v20, %v1409_v40 }
0x1022   :  { %v1493_v42 = vrot.slane %v1411_v41, 4 }
0x1024   :  { %1494 = vrot.lane.b32.xlu1 %v1493_v42, %s2901_s4 }
0x1090   :  { %v1415_v43 = vpop.permute.xlu0 %1414 }
0x1091   :  { %2490 = vmatmul.mubr.msk.f32.vlgmr.msra.gmra.mrb[12].mxu1 %vm154_vm2, %v1415_v43 }
0x1092   :  { %2655 = vmatpush3.bf16.msra.mxu1 %v3000_v8  ;;  %2511 = vmatprep.mubr.msk.f32.mxu1 %vm2899_vm1, %v2897_v3 }
0x1093   :  { %2656 = vmatprep.subr.bf16.mxu1 %v2898_v7 }
0x1096   :  { %v1495_v44 = vpop.permute.xlu1 %1494  ;;  %2658 = vmatpush3.bf16.msra.mxu1 %v3026_v16 }
0x1097   :  { %2501 = vmatmul.mubr.msk.f32.vlgmr.msra.gmra.mrb[16].mxu0 %vm154_vm2, %v1495_v44  ;;  %2665 = vmatprep.subr.bf16.mxu1 %v2898_v7 }
0x1098   :  { %2661 = vmatpush3.bf16.msra.mxu0 %v3010_v11  ;;  %2522 = vmatprep.mubr.msk.f32.mxu0 %vm2899_vm1, %v2897_v3 }
0x1099   :  { %2662 = vmatprep.subr.bf16.mxu0 %v2898_v7 }
0x109c   :  { %2664 = vmatpush3.bf16.msra.mxu0 %v3030_v17 }
0x109d   :  { %2671 = vmatprep.subr.bf16.mxu0 %v2898_v7 }
0x1164   :  { %v1484_v8 = vpop.f32.mrb[12].mxu1 }
0x1165   :  { %v1489_v45 = vrot.slane %v1484_v8, 4  ;;  %v2491_v46 = vpop.f32.mrb[13].mxu1 }
0x1167   :  { %v1491_v16 = vadd.f32 %v1489_v45, %v3061_v29 }
0x1169   :  { %2793 = vtanh.f32 %v1491_v16  ;;  %v2237_v17 = vmul.f32 -1.442695, %v1491_v16 }
0x116a   :  { %v1564_v47 = vpop.f32.mrb[16].mxu0 }
0x116b   :  { %v1569_v48 = vrot.slane %v1564_v47, 6  ;;  %v2502_v49 = vpop.f32.mrb[17].mxu0 }
0x116d   :  { %v1571_v11 = vadd.f32 %v1569_v48, %v3059_v26 }
0x116f   :  { %2795 = vtanh.f32 %v1571_v11  ;;  %v2238_v52 = vmul.f32 -1.442695, %v1571_v11  ;;  %v1837_v11 = vld [vmem:[%s3400_s5] sm:$0xff] }
0x1170   :  { %2797 = vpow2.f32 %v2237_v17 }
0x1171   :  { %2799 = vpow2.f32 %v2238_v52  ;;  %v1842_v52 = vld [vmem:[%s3401_s6 + $0x8] sm:$0xff] }
0x1173   :  { %v2794_v50 = vpop.eup %2793 }
0x1174   :  { %1584 = vrot.lane.b32.xlu0 %v2794_v50, %s2900_s2  ;;  %v1838_v50 = vld [vmem:[%s3400_s5 + $0x8] sm:$0xff] }
0x1175   :  { %v2672_v17 = vpack.c.bf16 %v1838_v50, %v1837_v11 }
0x1179   :  { %v2796_v51 = vpop.eup %2795 }
0x117a   :  { %1611 = vrot.lane.b32.xlu1 %v2796_v51, %s2900_s2  ;;  %v2798_v53 = vpop.eup %2797  ;;  %v1841_v51 = vld [vmem:[%s3401_s6] sm:$0xff] }
0x117b   :  { %v1575_v54 = vadd.f32 1.0, %v2798_v53  ;;  %v2800_v31 = vpop.eup %2799  ;;  %v1839_v53 = vld [vmem:[%s3400_s5 + $0x10] sm:$0xff] }
0x117c   :  { %v1602_v55 = vadd.f32 1.0, %v2800_v31  ;;  %v2666_v31 = vpack.c.bf16 %v1842_v52, %v1841_v51 }
0x117d   :  { %2801 = vrcp.f32 %v1575_v54  ;;  %v1840_v54 = vld [vmem:[%s3400_s5 + $0x18] sm:$0xff] }
0x117e   :  { %2803 = vrcp.f32 %v1602_v55  ;;  %v1843_v55 = vld [vmem:[%s3401_s6 + $0x10] sm:$0xff] }
0x1187   :  { %v2802_v36 = vpop.eup %2801 }
0x1188   :  { %v2804_v58 = vpop.eup %2803  ;;  %v1582_v62 = vmul.f32 %v2802_v36, %v1580_v61 }
0x1189   :  { %v1609_v2 = vmul.f32 %v2804_v58, %v1607_v1  ;;  %v2004_v1 = vld [vmem:[%s3403_s8] sm:$0xff] }
0x11e6   :  { %v1585_v56 = vpop.permute.xlu0 %1584 }
0x11e7   :  { %v1587_v57 = vmul.f32 %v2802_v36, %v1585_v56  ;;  %v2675_v56 = vpack.c.bf16 %v1840_v54, %v1839_v53 }
0x11e9   :  { %1589 = vrot.lane.b32.xlu0 %v1587_v57, %s2901_s4 }
0x11ec   :  { %v1612_v59 = vpop.permute.xlu1 %1611 }
0x11ed   :  { %v1614_v60 = vmul.f32 %v2804_v58, %v1612_v59 }
0x11ef   :  { %1616 = vrot.lane.b32.xlu1 %v1614_v60, %s2901_s4 }
0x125b   :  { %v1590_v63 = vpop.permute.xlu0 %1589 }
0x125c   :  { %v1592_v0 = vadd.f32 %v1590_v63, %v1582_v62 }
0x125e   :  { %2805 = vtanh.f32 %v1592_v0  ;;  %v1791_v44 = vrot.slane %v1592_v0, 6 }
0x1261   :  { %v1617_v4 = vpop.permute.xlu1 %1616 }
0x1262   :  { %v1619_v5 = vadd.f32 %v1617_v4, %v1609_v2  ;;  %v2005_v2 = vld [vmem:[%s3403_s8 + $0x8] sm:$0xff]  ;;  %v2008_v4 = vld [vmem:[%s3404_s9] sm:$0xff] }
0x1264   :  { %2807 = vtanh.f32 %v1619_v5  ;;  %v1818_v46 = vrot.slane %v1619_v5, 2  ;;  %v2009_v5 = vld [vmem:[%s3404_s9 + $0x8] sm:$0xff] }
0x1268   :  { %v2806_v6 = vpop.eup %2805 }
0x1269   :  { %1595 = vrot.lane.b32.xlu0 %v2806_v6, %s2900_s2  ;;  %v2684_v6 = vpack.c.bf16 %v2005_v2, %v2004_v1 }
0x126e   :  { %v2808_v9 = vpop.eup %2807 }
0x126f   :  { %1622 = vrot.lane.b32.xlu1 %v2808_v9, %s2900_s2  ;;  %v2006_v9 = vld [vmem:[%s3403_s8 + $0x10] sm:$0xff] }
0x12db   :  { %v1596_v10 = vpop.permute.xlu0 %1595 }
0x12dc   :  { %v1598_v12 = vmul.f32 %v2802_v36, %v1596_v10  ;;  %v1844_v36 = vld [vmem:[%s3401_s6 + $0x18] sm:$0xff] }
0x12dd   :  { %v2669_v57 = vpack.c.bf16 %v1844_v36, %v1843_v55  ;;  %v2007_v10 = vld [vmem:[%s3403_s8 + $0x18] sm:$0xff] }
0x12de   :  { %v1627_v13 = vrot.slane %v1598_v12, 4 }
0x12e0   :  { %1628 = vrot.lane.b32.xlu0 %v1627_v13, %s2901_s4  ;;  %v2678_v13 = vpack.c.bf16 %v2009_v5, %v2008_v4 }
0x12e1   :  { %v1623_v14 = vpop.permute.xlu1 %1622 }
0x12e2   :  { %v1625_v15 = vmul.f32 %v2804_v58, %v1623_v14  ;;  %v2010_v14 = vld [vmem:[%s3404_s9 + $0x10] sm:$0xff] }
0x12e4   :  { %v1707_v18 = vrot.slane %v1625_v15, 2  ;;  %v2011_v15 = vld [vmem:[%s3404_s9 + $0x18] sm:$0xff] }
0x12e6   :  { %1708 = vrot.lane.b32.xlu1 %v1707_v18, %s2901_s4 }
0x1352   :  { %v1629_v19 = vpop.permute.xlu0 %1628 }
0x1353   :  { %2512 = vmatmul.mubr.msk.f32.vlgmr.msra.gmra.mrb[14].mxu1 %vm154_vm2, %v1629_v19  ;;  %v2687_v19 = vpack.c.bf16 %v2007_v10, %v2006_v9 }
0x1354   :  { %2533 = vmatprep.mubr.msk.f32.mxu1 %vm2899_vm1, %v2897_v3  ;;  %2667 = vmatpush3.bf16.msra.mxu1 %v2666_v31 }
0x1355   :  { %2668 = vmatprep.subr.bf16.mxu1 %v2898_v7 }
0x1358   :  { %v1709_v20 = vpop.permute.xlu1 %1708  ;;  %2670 = vmatpush3.bf16.msra.mxu1 %v2669_v57 }
0x1359   :  { %2523 = vmatmul.mubr.msk.f32.vlgmr.msra.gmra.mrb[18].mxu0 %vm154_vm2, %v1709_v20  ;;  %2677 = vmatprep.subr.bf16.mxu1 %v2898_v7  ;;  %v2681_v20 = vpack.c.bf16 %v2011_v15, %v2010_v14 }
0x135a   :  { %2544 = vmatprep.mubr.msk.f32.mxu0 %vm2899_vm1, %v2897_v3  ;;  %2673 = vmatpush3.bf16.msra.mxu0 %v2672_v17 }
0x135b   :  { %2674 = vmatprep.subr.bf16.mxu0 %v2898_v7 }
0x135e   :  { %2676 = vmatpush3.bf16.msra.mxu0 %v2675_v56 }
0x135f   :  { %2683 = vmatprep.subr.bf16.mxu0 %v2898_v7 }
0x1426   :  { %v1698_v21 = vpop.f32.mrb[14].mxu1 }
0x1427   :  { %v1703_v22 = vrot.slane %v1698_v21, 2  ;;  %v2513_v23 = vpop.f32.mrb[15].mxu1 }
0x1429   :  { %v1705_v24 = vadd.f32 %v1703_v22, %v3061_v29 }
0x142b   :  { %2809 = vtanh.f32 %v1705_v24  ;;  %v2241_v33 = vmul.f32 -1.442695, %v1705_v24  ;;  %v2245_v24 = vld [vmem:[%s3402_s7] ss:$0 sm:$0xff] }
0x142c   :  { %v1778_v25 = vpop.f32.mrb[18].mxu0 }
0x142d   :  { %v1782_v27 = vadd.f32 %v1778_v25, %v3059_v26  ;;  %v2524_v28 = vpop.f32.mrb[19].mxu0 }
0x142f   :  { %2811 = vtanh.f32 %v1782_v27  ;;  %v2242_v34 = vmul.f32 -1.442695, %v1782_v27 }
0x1430   :  { %2813 = vpow2.f32 %v2241_v33 }
0x1431   :  { %2815 = vpow2.f32 %v2242_v34 }
0x1435   :  { %v2810_v30 = vpop.eup %2809 }
0x1436   :  { %1795 = vrot.lane.b32.xlu0 %v2810_v30, %s2900_s2 }
0x1439   :  { %v2812_v32 = vpop.eup %2811 }
0x143a   :  { %1822 = vrot.lane.b32.xlu1 %v2812_v32, %s2900_s2  ;;  %v2814_v35 = vpop.eup %2813 }
0x143b   :  { %v1786_v37 = vadd.f32 1.0, %v2814_v35  ;;  %v2816_v38 = vpop.eup %2815 }
0x143c   :  { %v1813_v29 = vadd.f32 1.0, %v2816_v38 }
0x143d   :  { %2817 = vrcp.f32 %v1786_v37 }
0x143e   :  { %2819 = vrcp.f32 %v1813_v29 }
0x1447   :  { %v2818_v39 = vpop.eup %2817 }
0x1448   :  { %v2820_v41 = vpop.eup %2819  ;;  %v1793_v8 = vmul.f32 %v2818_v39, %v1791_v44 }
0x1449   :  { %v1820_v47 = vmul.f32 %v2820_v41, %v1818_v46 }
0x14a8   :  { %v1796_v26 = vpop.permute.xlu0 %1795 }
0x14a9   :  { %v1798_v40 = vmul.f32 %v2818_v39, %v1796_v26 }
0x14ab   :  { %1800 = vrot.lane.b32.xlu0 %v1798_v40, %s2901_s4 }
0x14ac   :  { %v1823_v42 = vpop.permute.xlu1 %1822 }
0x14ad   :  { %v1825_v43 = vmul.f32 %v2820_v41, %v1823_v42 }
0x14af   :  { %1827 = vrot.lane.b32.xlu1 %v1825_v43, %s2901_s4 }
0x151d   :  { %v1801_v45 = vpop.permute.xlu0 %1800 }
0x151e   :  { %v1803_v16 = vadd.f32 %v1801_v45, %v1793_v8 }
0x1520   :  { %2821 = vtanh.f32 %v1803_v16 }
0x1521   :  { %v1828_v48 = vpop.permute.xlu1 %1827 }
0x1522   :  { %v1830_v49 = vadd.f32 %v1828_v48, %v1820_v47 }
0x1524   :  { %2823 = vtanh.f32 %v1830_v49 }
0x152a   :  { %v2822_v58 = vpop.eup %2821 }
0x152b   :  { %1806 = vrot.lane.b32.xlu0 %v2822_v58, %s2900_s2 }
0x152e   :  { %v2824_v59 = vpop.eup %2823 }
0x152f   :  { %1833 = vrot.lane.b32.xlu1 %v2824_v59, %s2900_s2 }
0x159d   :  { %v1807_v60 = vpop.permute.xlu0 %1806 }
0x159e   :  { %v1809_v61 = vmul.f32 %v2818_v39, %v1807_v60 }
0x15a0   :  { %v1921_v62 = vrot.slane %v1809_v61, 6 }
0x15a1   :  { %v1834_v63 = vpop.permute.xlu1 %1833 }
0x15a2   :  { %v1836_v0 = vmul.f32 %v2820_v41, %v1834_v63  ;;  %1922 = vrot.lane.b32.xlu1 %v1921_v62, %s2901_s4 }
0x15a4   :  { %1846 = vrot.lane.b32.xlu0 %v1836_v0, %s2901_s4 }
0x1614   :  { %v1923_v12 = vpop.permute.xlu1 %1922 }
0x1615   :  { %2545 = vmatmul.mubr.msk.f32.vlgmr.msra.gmra.mrb[20].mxu0 %vm154_vm2, %v1923_v12 }
0x1616   :  { %2685 = vmatpush3.bf16.msra.mxu0 %v2684_v6  ;;  %v1847_v18 = vpop.permute.xlu0 %1846  ;;  %2566 = vmatprep.mubr.msk.f32.mxu0 %vm2899_vm1, %v2897_v3 }
0x1617   :  { %2534 = vmatmul.mubr.msk.f32.vlgmr.msra.gmra.mrb[16].mxu1 %vm154_vm2, %v1847_v18  ;;  %2686 = vmatprep.subr.bf16.mxu0 %v2898_v7 }
0x1618   :  { %2679 = vmatpush3.bf16.msra.mxu1 %v2678_v13  ;;  %2555 = vmatprep.mubr.msk.f32.mxu1 %vm2899_vm1, %v2897_v3 }
0x1619   :  { %2680 = vmatprep.subr.bf16.mxu1 %v2898_v7 }
0x161a   :  { %2688 = vmatpush3.bf16.msra.mxu0 %v2687_v19 }
0x161c   :  { %2682 = vmatpush3.bf16.msra.mxu1 %v2681_v20 }
0x161d   :  { %2567 = vmatmul.mubr.msk.f32.vlgmr.msra.gmra.mrb[22].mxu0 %vm154_vm2, %v1923_v12 }
0x161f   :  { %2556 = vmatmul.mubr.msk.f32.vlgmr.msra.gmra.mrb[18].mxu1 %vm154_vm2, %v1847_v18 }
0x16e8   :  { %v1992_v21 = vpop.f32.mrb[20].mxu0 }
0x16e9   :  { %v2546_v22 = vpop.f32.mrb[21].mxu0 }
0x16ea   :  { %v1916_v23 = vpop.f32.mrb[16].mxu1 }
0x16eb   :  { %v1993_v25 = vadd.f32 %v1992_v21, %v1916_v23  ;;  %v2535_v27 = vpop.f32.mrb[17].mxu1 }
0x16ed   :  { %v2003_v3 = vadd.f32 %v2245_v24, %v1993_v25 }
0x16ef   :  { %2168 = vst.msk [vmem:[#allocation4] sm:$0x3] %vm2166_vm3, %v2003_v3 }
0x16f0   :  { %v2148_v7 = vpop.f32.mrb[22].mxu0 }
0x16f1   :  { %2838 = shalt.err (!%p2835_p4)
}
0x16f2   :  { %s2839_s7 = scalar_lea.hbm %s3408_s13, 32 }
0x16f3   :  { %p2840_p5 = scmp.ne.s32.totalorder %s3408_s13, %s2839_s7  ;;  %p2843_p6 = scmp.lt.u32.totalorder %s2839_s7, %s3408_s13 }
0x16f5   :  { %p2845_p7 = pnand %p2843_p6, %p2840_p5 }
0x16f7   :  { %2848 = shalt.err (!%p2845_p7)
}
0x16f8   :  { %2189 = dma.vmem_to_hbm [thread:$0]  %s2187_s29, 32, %s3408_s13, [#allocation5]   ;;  %v2568_v28 = vpop.f32.mrb[23].mxu0  ;;  %v2078_v30 = vpop.f32.mrb[18].mxu1  ;;  %v2248_v32 = vld [vmem:[%s3405_s10] ss:$0 sm:$0xff] }
0x16f9   :  { %s2903_s2 = smov [#allocation6]   ;;  %v2149_v33 = vadd.f32 %v2148_v7, %v2078_v30  ;;  %v2557_v34 = vpop.f32.mrb[19].mxu1 }
0x16fa   :  { %s2196_s21 = sshll.u32 %s2903_s2, 4  ;;  %s2197_s21 = int_to_ptr.vmem [resolvable:$true] %s2196_s21 }
0x16fb   :  { %v2159_v35 = vadd.f32 %v2248_v32, %v2149_v33  ;;  %s2849_s22 = scalar_lea.vmem %s2197_s21, 32  ;;  %p2854_p9 = scmp.lt.s32.totalorder %s2197_s21, %s2197_s21 }
0x16fc   :  { %p2850_p8 = scmp.ne.s32.totalorder %s2197_s21, %s2849_s22  ;;  %p2855_p10 = scmp.lt.s32.totalorder %s2849_s22, %s2849_s22 }
0x16fd   :  { %v2160_v37 = vmul.f32 0.5, %v2159_v35  ;;  %2169 = vst.msk [vmem:[#allocation6] sm:$0x3] %vm2166_vm3, %v2159_v35 }
0x16fe   :  { %p2856_p11 = por %p2855_p10, %p2854_p9 }
0x1700   :  { %p2857_p12 = pnand %p2856_p11, %p2850_p8 }
0x1702   :  { %2860 = shalt.err (!%p2857_p12)
}
0x1703   :  { %s2861_s10 = scalar_lea.hbm %s3409_s14, 32 }
0x1704   :  { %p2862_p13 = scmp.ne.s32.totalorder %s3409_s14, %s2861_s10  ;;  %p2865_p0 = scmp.lt.u32.totalorder %s2861_s10, %s3409_s14 }
0x1706   :  { %p2867_p1 = pnand %p2865_p0, %p2862_p13 }
0x1708   :  { %2870 = shalt.err (!%p2867_p1)
}
0x1709   :  { %2199 = dma.vmem_to_hbm [thread:$0]  %s2197_s21, 32, %s3409_s14, [#allocation5]   ;;  %v2161_v38 = vmul.f32 1.442695, %v2160_v37  ;;  %v2163_v29 = vld [vmem:[%s3406_s11] sm:$0x3] }
0x170a   :  { %s2904_s28 = smov [#allocation2]  }
0x170b   :  { %2825 = vpow2.f32 %v2161_v38  ;;  %s2176_s29 = sshll.u32 %s2904_s28, 4  ;;  %s2177_s29 = int_to_ptr.vmem [resolvable:$true] %s2176_s29 }
0x170c   :  { %s2871_s30 = scalar_lea.vmem %s2177_s29, 32  ;;  %p2876_p3 = scmp.lt.s32.totalorder %s2177_s29, %s2177_s29 }
0x170d   :  { %p2872_p2 = scmp.ne.s32.totalorder %s2177_s29, %s2871_s30  ;;  %p2877_p4 = scmp.lt.s32.totalorder %s2871_s30, %s2871_s30 }
0x170f   :  { %p2878_p5 = por %p2877_p4, %p2876_p3 }
0x1711   :  { %p2879_p6 = pnand %p2878_p5, %p2872_p2 }
0x1715   :  { %v2826_v39 = vpop.eup %2825 }
0x1716   :  { %v2164_v26 = vmul.f32 %v2826_v39, %v2163_v29 }
0x1718   :  { %v2165_v40 = vadd.f32 %v2164_v26, %v2003_v3 }
0x171a   :  { %2167 = vst.msk [vmem:[#allocation2] sm:$0x3] %vm2166_vm3, %v2165_v40 }
0x171b   :  { %2882 = shalt.err (!%p2879_p6)
}
0x171c   :  { %s2883_s16 = scalar_lea.hbm %s3407_s12, 32 }
0x171d   :  { %p2884_p7 = scmp.ne.s32.totalorder %s3407_s12, %s2883_s16  ;;  %p2887_p8 = scmp.lt.u32.totalorder %s2883_s16, %s3407_s12 }
0x171f   :  { %p2889_p9 = pnand %p2887_p8, %p2884_p7 }
0x1721   :  { %2892 = shalt.err (!%p2889_p9)
}
0x1722   :  { %2179 = dma.vmem_to_hbm [thread:$0]  %s2177_s29, 32, %s3407_s12, [#allocation3]  }
0x1723   :  { %2893 = dma.done.wait [#allocation3], 32  }
0x1724   :  { %2894 = vsyncadd [#allocation3], 4294967264 }
0x1725   :  { %2895 = dma.done.wait [#allocation5], 64  }
0x1726   :  { %2896 = vsyncadd [#allocation5], 4294967232 }
0x1727   :  { %2209 = vsyncpa [#allocation3], 1 }
0x1728   :  { %2210 = vsyncpa [#allocation5], 1 }

</bundles_post_ra>
